<compile_context>
chip_gen: v5e
topology: v5e:2x2
jax: 0.10.0
libtpu: 0.0.40
codegen_flags: <defaults>
</compile_context>

<pallas_src>
import functools
import math

import jax
import jax.numpy as jnp
from jax.experimental import pallas as pl
from jax.experimental.pallas import tpu as pltpu


def _encoder_kernel(xq_ref, xkv_ref, wq_ref, bq_ref, wkv_ref, bkv_ref, wo_ref, bo_ref,
                    g1_ref, beta1_ref, w1_ref, b1_ref, w2_ref, b2_ref,
                    g2_ref, beta2_ref, o_ref, *, num_heads, head_dim):
    """One (TQ, Din) query block of one sequence per grid step.

    Refs (leading batch dim squeezed by the BlockSpecs):
      xq_ref   (TQ, Din)      f32   query block (also the residual operand)
      xkv_ref  (L,  Din)      f32   full sequence (source of K / V)
      wq_ref   (Din, dim)     bf16  Wq, pre-scaled by 1/sqrt(Dh)
      bq_ref   (1, dim)       f32   bq, pre-scaled
      wkv_ref  (Din, 2*dim)   bf16  [Wk | Wv]
      bkv_ref  (1, 2*dim)     f32   [bk | bv]
      wo_ref   (dim, attn)    bf16  output projection (original 2-D layout)
      remaining: biases / FF weights / LayerNorm params
    """
    H, Dh = num_heads, head_dim
    dim = H * Dh
    eps = 1e-5                                     # PyTorch nn.LayerNorm default

    xq = xq_ref[...]                               # (TQ, Din) f32, kept for residual
    xq_b = xq.astype(jnp.bfloat16)
    xkv_b = xkv_ref[...].astype(jnp.bfloat16)      # (L, Din)

    # ---- Q projection: one wide 2-D MXU matmul (N = dim); softmax scale folded in ----
    q2d = (jnp.dot(xq_b, wq_ref[...], preferred_element_type=jnp.float32)
           + bq_ref[...]).astype(jnp.bfloat16)                             # (TQ, dim)

    # ---- K/V projection of the full sequence: one wide 2-D MXU matmul (N = 2*dim) ----
    kv2d = (jnp.dot(xkv_b, wkv_ref[...], preferred_element_type=jnp.float32)
            + bkv_ref[...]).astype(jnp.bfloat16)                           # (L, 2*dim)

    # Carve heads with static lane slices + leading-axis stack (no broadcast of x,
    # single bf16 cast per projection above).
    def split_heads(m):            # (rows, H*Dh) -> (H, rows, Dh)
        return jnp.stack([m[:, h * Dh:(h + 1) * Dh] for h in range(H)], axis=0)

    q = split_heads(q2d)                            # (H, TQ, Dh) bf16
    k = split_heads(kv2d[:, :dim])                  # (H, L,  Dh) bf16
    v = split_heads(kv2d[:, dim:])                  # (H, L,  Dh) bf16

    # ---- scaled-dot-product attention, batched over heads (softmax stats in f32) ----
    s = jnp.einsum("hqd,hkd->hqk", q, k, preferred_element_type=jnp.float32)  # (H,TQ,L)
    s = s - jnp.max(s, axis=-1, keepdims=True)      # stable softmax (math-equivalent)
    p = jnp.exp(s)
    p = p * pl.reciprocal(jnp.sum(p, axis=-1, keepdims=True), approx=True)
    pv = jnp.einsum("hqk,hkd->hqd", p.astype(jnp.bfloat16), v,
                    preferred_element_type=jnp.float32)                    # (H, TQ, Dh)
    # TODO(synk): for very long L, tile KV with an online softmax (and on v7x accumulate
    # PV into an f32 scratch with += so the MRB does the adds) instead of (H,TQ,L) scores.

    # ---- merge heads + output projection: single matmul with K = H*Dh (== concat@Wo) ----
    pv_b = pv.astype(jnp.bfloat16)
    merged = jnp.concatenate([pv_b[h] for h in range(H)], axis=-1)         # (TQ, dim)
    ao = jnp.dot(merged, wo_ref[...], preferred_element_type=jnp.float32) + bo_ref[...]

    # ---- residual + LayerNorm 1 (f32) ----
    r1 = ao + xq
    mu1 = jnp.mean(r1, axis=-1, keepdims=True)
    var1 = jnp.mean((r1 - mu1) * (r1 - mu1), axis=-1, keepdims=True)
    x1 = (r1 - mu1) * jax.lax.rsqrt(var1 + eps) * g1_ref[...] + beta1_ref[...]
    # TODO(synk): nn.Dropout treated as identity (eval mode); no in-kernel RNG dropout.

    # ---- FeedForward (bf16 MXU operands, f32 accumulation) ----
    h1 = jnp.maximum(
        jnp.dot(x1.astype(jnp.bfloat16), w1_ref[...],
                preferred_element_type=jnp.float32) + b1_ref[...], 0.0)
    ff = jnp.dot(h1.astype(jnp.bfloat16), w2_ref[...],
                 preferred_element_type=jnp.float32) + b2_ref[...]

    # ---- residual + LayerNorm 2 (f32) ----
    r2 = x1 + ff
    mu2 = jnp.mean(r2, axis=-1, keepdims=True)
    var2 = jnp.mean((r2 - mu2) * (r2 - mu2), axis=-1, keepdims=True)
    out = (r2 - mu2) * jax.lax.rsqrt(var2 + eps) * g2_ref[...] + beta2_ref[...]

    o_ref[...] = out.astype(o_ref.dtype)


def _pick_vmem_limit():
    """Generation-aware scoped-VMEM limit (≈48 MiB on v7x, ≈96 MiB on v5e/v6e)."""
    try:
        cap = int(pltpu.get_tpu_info().vmem_capacity_bytes)
    except Exception:
        cap = 64 * 1024 * 1024     # conservative fallback (v7x per-TC VMEM)
    return max(32 * 1024 * 1024, min(int(cap * 3 // 4), 100 * 1024 * 1024))


def encoder_forward(x, kparams, *, num_heads, head_dim, tq=None):
    """x: (N, L, input_dim) f32.  kparams: output of `prepare_params`.  Returns (N, L, attn)."""
    N, L, Din = x.shape
    H, Dh = num_heads, head_dim
    dim = H * Dh
    attn_dim = kparams["wo"].shape[-1]
    ff_dim = kparams["w1"].shape[-1]
    assert attn_dim == Din, "residual path requires attention_dim == input_dim"

    # Query-block size: keep scores at (H, TQ, L) instead of (H, L, L).
    if tq is None:
        tq = L
        for cand in (512, 256, 128):
            if L > cand and L % cand == 0:
                tq = cand
                break
    assert L % tq == 0, "tq must divide L"
    n_q = L // tq

    kernel = functools.partial(_encoder_kernel, num_heads=H, head_dim=Dh)

    flops = N * (2 * L * Din * dim                    # Q projection
                 + 2 * n_q * L * Din * 2 * dim        # K/V projection (per q block)
                 + 4 * H * L * L * Dh                 # scores + PV
                 + 2 * L * dim * attn_dim             # output projection
                 + 2 * L * attn_dim * ff_dim * 2)     # FF1 + FF2
    bytes_accessed = (2 * x.size * x.dtype.itemsize
                      + N * L * attn_dim * 4
                      + sum(int(v.size) * v.dtype.itemsize for v in kparams.values()))
    cost = pl.CostEstimate(flops=int(flops),
                           transcendentals=int(N * H * L * L),
                           bytes_accessed=int(bytes_accessed))

    args = (x, x,
            kparams["wq"], kparams["bq"], kparams["wkv"], kparams["bkv"],
            kparams["wo"], kparams["bo"], kparams["gamma1"], kparams["beta1"],
            kparams["w1"], kparams["b1"], kparams["w2"], kparams["b2"],
            kparams["gamma2"], kparams["beta2"])

    def _make_call(single_buffer_weights):
        wk = {}
        if single_buffer_weights:
            # Constant-index weight blocks: no need for double buffering.
            wk = dict(pipeline_mode=pl.Buffered(buffer_count=1))
        rep = lambda shp: pl.BlockSpec(shp, lambda n, qi: (0,) * len(shp), **wk)
        grid_spec = pltpu.PrefetchScalarGridSpec(
            num_scalar_prefetch=0,
            grid=(N, n_q),               # sequences x query blocks, both independent
            in_specs=[
                pl.BlockSpec((None, tq, Din), lambda n, qi: (n, qi, 0)),  # x (query block)
                pl.BlockSpec((None, L, Din), lambda n, qi: (n, 0, 0)),    # x (full, K/V)
                rep((Din, dim)),          # wq  (bf16, scale folded)
                rep((1, dim)),            # bq
                rep((Din, 2 * dim)),      # wkv (bf16)
                rep((1, 2 * dim)),        # bkv
                rep((dim, attn_dim)),     # wo  (bf16)
                rep((1, attn_dim)),       # bo
                rep((1, attn_dim)),       # gamma1
                rep((1, attn_dim)),       # beta1
                rep((attn_dim, ff_dim)),  # w1 (bf16)
                rep((1, ff_dim)),         # b1
                rep((ff_dim, attn_dim)),  # w2 (bf16)
                rep((1, attn_dim)),       # b2
                rep((1, attn_dim)),       # gamma2
                rep((1, attn_dim)),       # beta2
            ],
            out_specs=pl.BlockSpec((None, tq, attn_dim), lambda n, qi: (n, qi, 0)),
        )
        return pl.pallas_call(
            kernel,
            # TODO(synk): emit bf16 output if downstream tolerates it (halves writeback).
            out_shape=jax.ShapeDtypeStruct((N, L, attn_dim), jnp.float32),
            grid_spec=grid_spec,
            compiler_params=pltpu.CompilerParams(
                dimension_semantics=("parallel", "parallel"),
                vmem_limit_bytes=_pick_vmem_limit()),
            cost_estimate=cost,
        )

    try:
        return _make_call(True)(*args)
    except Exception:
        # Fallback for jax versions without BlockSpec pipeline_mode / pl.Buffered(1).
        return _make_call(False)(*args)


def init_params(key, input_dim, num_heads, head_dim, attention_dim, ff_dim):
    """PyTorch-layout f32 parameters (nn.Linear default init)."""
    dim = num_heads * head_dim
    ks = jax.random.split(key, 4)

    def lin(k, fan_in, fan_out):
        bound = 1.0 / math.sqrt(fan_in)
        kw, kb = jax.random.split(k)
        w = jax.random.uniform(kw, (fan_in, fan_out), jnp.float32, -bound, bound)
        b = jax.random.uniform(kb, (1, fan_out), jnp.float32, -bound, bound)
        return w, b

    wqkv, bqkv = lin(ks[0], input_dim, 3 * dim)
    wo, bo = lin(ks[1], dim, attention_dim)
    w1, b1 = lin(ks[2], attention_dim, ff_dim)
    w2, b2 = lin(ks[3], ff_dim, attention_dim)
    return dict(wqkv=wqkv, bqkv=bqkv, wo=wo, bo=bo, w1=w1, b1=b1, w2=w2, b2=b2,
                gamma1=jnp.ones((1, attention_dim), jnp.float32),
                beta1=jnp.zeros((1, attention_dim), jnp.float32),
                gamma2=jnp.ones((1, attention_dim), jnp.float32),
                beta2=jnp.zeros((1, attention_dim), jnp.float32))


def prepare_params(p, *, num_heads, head_dim):
    """Fold the 1/sqrt(Dh) softmax scale into Wq/bq, split Q vs K|V columns, cast
    matmul operands to bf16.  Weights stay in native (Din, out) 2-D layout so the
    kernel's projections are wide, 128/256-alignable MXU matmuls (for real configs
    keep dim / attention_dim / ff_dim multiples of 128)."""
    H, Dh = num_heads, head_dim
    dim = H * Dh
    scale = 1.0 / math.sqrt(Dh)
    return dict(
        wq=(p["wqkv"][:, :dim] * scale).astype(jnp.bfloat16),
        bq=(p["bqkv"][:, :dim] * scale).astype(jnp.float32),
        wkv=p["wqkv"][:, dim:].astype(jnp.bfloat16),
        bkv=p["bqkv"][:, dim:].astype(jnp.float32),
        wo=p["wo"].astype(jnp.bfloat16), bo=p["bo"].astype(jnp.float32),
        w1=p["w1"].astype(jnp.bfloat16), b1=p["b1"].astype(jnp.float32),
        w2=p["w2"].astype(jnp.bfloat16), b2=p["b2"].astype(jnp.float32),
        gamma1=p["gamma1"], beta1=p["beta1"],
        gamma2=p["gamma2"], beta2=p["beta2"],
    )


def encoder_reference(x, p, *, num_heads, head_dim):
    """Pure-JAX f32 reference mirroring the PyTorch forward (dropout = identity)."""
    N, L, _ = x.shape
    dim = num_heads * head_dim
    qkv = x @ p["wqkv"] + p["bqkv"]
    q = qkv[:, :, :dim].reshape(N, L, num_heads, head_dim)
    k = qkv[:, :, dim:2 * dim].reshape(N, L, num_heads, head_dim)
    v = qkv[:, :, 2 * dim:].reshape(N, L, num_heads, head_dim)
    scores = jnp.einsum("nqhd,nkhd->nhqk", q, k) / math.sqrt(head_dim)
    attn = jax.nn.softmax(scores, axis=3)
    out = jnp.einsum("nhql,nlhd->nqhd", attn, v).reshape(N, L, dim)
    ao = out @ p["wo"] + p["bo"]

    def ln(y, g, b):
        mu = jnp.mean(y, -1, keepdims=True)
        var = jnp.mean((y - mu) ** 2, -1, keepdims=True)
        return (y - mu) / jnp.sqrt(var + 1e-5) * g + b

    x1 = ln(ao + x, p["gamma1"], p["beta1"])
    ff = jnp.maximum(x1 @ p["w1"] + p["b1"], 0.0) @ p["w2"] + p["b2"]
    return ln(x1 + ff, p["gamma2"], p["beta2"])


if __name__ == "__main__":
    # Small shapes consistent with the module: residual requires attention_dim == input_dim.
    N, L = 2, 8
    input_dim = attention_dim = 32
    num_heads, head_dim = 4, 8
    ff_dim = 64

    key = jax.random.PRNGKey(0)
    kx, kp = jax.random.split(key)
    x = jax.random.normal(kx, (N, L, input_dim), jnp.float32)
    params = init_params(kp, input_dim, num_heads, head_dim, attention_dim, ff_dim)
    kparams = prepare_params(params, num_heads=num_heads, head_dim=head_dim)

    out = encoder_forward(x, kparams, num_heads=num_heads, head_dim=head_dim)
    out = jax.block_until_ready(out)

    ref = encoder_reference(x, params, num_heads=num_heads, head_dim=head_dim)
    assert out.shape == (N, L, attention_dim)
    # Kernel uses bf16 matmul operands (f32 accumulation) and an approx reciprocal in the
    # softmax, so compare against the f32 reference with a bf16-appropriate tolerance.
    assert jnp.allclose(out, ref, atol=3e-2, rtol=3e-2), "mismatch vs reference"

    print("KERNEL_OK")
</pallas_src>

<mosaic_0001>
module attributes {stable_mosaic.version = 11 : i64} {
  func.func @_encoder_kernel(%arg0: i32, %arg1: i32, %arg2: memref<1x8x32xf32, #tpu.memory_space<vmem>>, %arg3: memref<1x8x32xf32, #tpu.memory_space<vmem>>, %arg4: memref<32x32xbf16, #tpu.memory_space<vmem>>, %arg5: memref<1x32xf32, #tpu.memory_space<vmem>>, %arg6: memref<32x64xbf16, #tpu.memory_space<vmem>>, %arg7: memref<1x64xf32, #tpu.memory_space<vmem>>, %arg8: memref<32x32xbf16, #tpu.memory_space<vmem>>, %arg9: memref<1x32xf32, #tpu.memory_space<vmem>>, %arg10: memref<1x32xf32, #tpu.memory_space<vmem>>, %arg11: memref<1x32xf32, #tpu.memory_space<vmem>>, %arg12: memref<32x64xbf16, #tpu.memory_space<vmem>>, %arg13: memref<1x64xf32, #tpu.memory_space<vmem>>, %arg14: memref<64x32xbf16, #tpu.memory_space<vmem>>, %arg15: memref<1x32xf32, #tpu.memory_space<vmem>>, %arg16: memref<1x32xf32, #tpu.memory_space<vmem>>, %arg17: memref<1x32xf32, #tpu.memory_space<vmem>>, %arg18: memref<1x8x32xf32, #tpu.memory_space<vmem>>) attributes {dimension_semantics = [#tpu.dimension_semantics<parallel>, #tpu.dimension_semantics<parallel>], iteration_bounds = array<i64: 2, 1>, scalar_prefetch = 0 : i64, scratch_operands = 0 : i64, tpu.core_type = #tpu.core_type<tc>, window_params = [{transform_indices = @transform_0, window_bounds = array<i64: 1, 8, 32>}, {transform_indices = @transform_1, window_bounds = array<i64: 1, 8, 32>}, {pipeline_mode = #tpu.pipeline_mode<synchronous>, transform_indices = @transform_2, window_bounds = array<i64: 32, 32>}, {pipeline_mode = #tpu.pipeline_mode<synchronous>, transform_indices = @transform_3, window_bounds = array<i64: 1, 32>}, {pipeline_mode = #tpu.pipeline_mode<synchronous>, transform_indices = @transform_4, window_bounds = array<i64: 32, 64>}, {pipeline_mode = #tpu.pipeline_mode<synchronous>, transform_indices = @transform_5, window_bounds = array<i64: 1, 64>}, {pipeline_mode = #tpu.pipeline_mode<synchronous>, transform_indices = @transform_6, window_bounds = array<i64: 32, 32>}, {pipeline_mode = #tpu.pipeline_mode<synchronous>, transform_indices = @transform_7, window_bounds = array<i64: 1, 32>}, {pipeline_mode = #tpu.pipeline_mode<synchronous>, transform_indices = @transform_8, window_bounds = array<i64: 1, 32>}, {pipeline_mode = #tpu.pipeline_mode<synchronous>, transform_indices = @transform_9, window_bounds = array<i64: 1, 32>}, {pipeline_mode = #tpu.pipeline_mode<synchronous>, transform_indices = @transform_10, window_bounds = array<i64: 32, 64>}, {pipeline_mode = #tpu.pipeline_mode<synchronous>, transform_indices = @transform_11, window_bounds = array<i64: 1, 64>}, {pipeline_mode = #tpu.pipeline_mode<synchronous>, transform_indices = @transform_12, window_bounds = array<i64: 64, 32>}, {pipeline_mode = #tpu.pipeline_mode<synchronous>, transform_indices = @transform_13, window_bounds = array<i64: 1, 32>}, {pipeline_mode = #tpu.pipeline_mode<synchronous>, transform_indices = @transform_14, window_bounds = array<i64: 1, 32>}, {pipeline_mode = #tpu.pipeline_mode<synchronous>, transform_indices = @transform_15, window_bounds = array<i64: 1, 32>}, {transform_indices = @transform_16, window_bounds = array<i64: 1, 8, 32>}]} {
    %c0 = arith.constant 0 : index
    %c0_0 = arith.constant 0 : index
    %c0_1 = arith.constant 0 : index
    %0 = vector.load %arg2[%c0, %c0_0, %c0_1] : memref<1x8x32xf32, #tpu.memory_space<vmem>>, vector<1x8x32xf32>
    %1 = vector.shape_cast %0 : vector<1x8x32xf32> to vector<8x32xf32>
    %2 = arith.truncf %1 : vector<8x32xf32> to vector<8x32xbf16>
    %c0_2 = arith.constant 0 : index
    %c0_3 = arith.constant 0 : index
    %c0_4 = arith.constant 0 : index
    %3 = vector.load %arg3[%c0_2, %c0_3, %c0_4] : memref<1x8x32xf32, #tpu.memory_space<vmem>>, vector<1x8x32xf32>
    %4 = vector.shape_cast %3 : vector<1x8x32xf32> to vector<8x32xf32>
    %5 = arith.truncf %4 : vector<8x32xf32> to vector<8x32xbf16>
    %c0_5 = arith.constant 0 : index
    %c0_6 = arith.constant 0 : index
    %6 = vector.load %arg4[%c0_5, %c0_6] : memref<32x32xbf16, #tpu.memory_space<vmem>>, vector<32x32xbf16>
    %cst = arith.constant dense<0.000000e+00> : vector<8x32xf32>
    %7 = tpu.matmul %2, %6, %cst {dimension_numbers = #tpu.dot_dimension_numbers<[1], [0], [0], [1], [0, 0, 1, 1], [], []>} : vector<8x32xbf16>, vector<32x32xbf16>, vector<8x32xf32> -> vector<8x32xf32>
    %c0_7 = arith.constant 0 : index
    %c0_8 = arith.constant 0 : index
    %8 = vector.load %arg5[%c0_7, %c0_8] : memref<1x32xf32, #tpu.memory_space<vmem>>, vector<1x32xf32>
    %9 = vector.broadcast %8 : vector<1x32xf32> to vector<8x32xf32>
    %10 = arith.addf %7, %9 : vector<8x32xf32>
    %11 = arith.truncf %10 : vector<8x32xf32> to vector<8x32xbf16>
    %c0_9 = arith.constant 0 : index
    %c0_10 = arith.constant 0 : index
    %12 = vector.load %arg6[%c0_9, %c0_10] : memref<32x64xbf16, #tpu.memory_space<vmem>>, vector<32x64xbf16>
    %cst_11 = arith.constant dense<0.000000e+00> : vector<8x64xf32>
    %13 = tpu.matmul %5, %12, %cst_11 {dimension_numbers = #tpu.dot_dimension_numbers<[1], [0], [0], [1], [0, 0, 1, 1], [], []>} : vector<8x32xbf16>, vector<32x64xbf16>, vector<8x64xf32> -> vector<8x64xf32>
    %c0_12 = arith.constant 0 : index
    %c0_13 = arith.constant 0 : index
    %14 = vector.load %arg7[%c0_12, %c0_13] : memref<1x64xf32, #tpu.memory_space<vmem>>, vector<1x64xf32>
    %15 = vector.broadcast %14 : vector<1x64xf32> to vector<8x64xf32>
    %16 = arith.addf %13, %15 : vector<8x64xf32>
    %17 = arith.truncf %16 : vector<8x64xf32> to vector<8x64xbf16>
    %18 = vector.extract_strided_slice %11 {offsets = [0, 0], sizes = [8, 8], strides = [1, 1]} : vector<8x32xbf16> to vector<8x8xbf16>
    %19 = vector.extract_strided_slice %11 {offsets = [0, 8], sizes = [8, 8], strides = [1, 1]} : vector<8x32xbf16> to vector<8x8xbf16>
    %20 = vector.extract_strided_slice %11 {offsets = [0, 16], sizes = [8, 8], strides = [1, 1]} : vector<8x32xbf16> to vector<8x8xbf16>
    %21 = vector.extract_strided_slice %11 {offsets = [0, 24], sizes = [8, 8], strides = [1, 1]} : vector<8x32xbf16> to vector<8x8xbf16>
    %22 = vector.shape_cast %18 : vector<8x8xbf16> to vector<1x8x8xbf16>
    %23 = vector.shape_cast %19 : vector<8x8xbf16> to vector<1x8x8xbf16>
    %24 = vector.shape_cast %20 : vector<8x8xbf16> to vector<1x8x8xbf16>
    %25 = vector.shape_cast %21 : vector<8x8xbf16> to vector<1x8x8xbf16>
    %26 = tpu.concatenate %22, %23, %24, %25 in 0 : vector<1x8x8xbf16>, vector<1x8x8xbf16>, vector<1x8x8xbf16>, vector<1x8x8xbf16> -> vector<4x8x8xbf16>
    %27 = vector.extract_strided_slice %17 {offsets = [0, 0], sizes = [8, 32], strides = [1, 1]} : vector<8x64xbf16> to vector<8x32xbf16>
    %28 = vector.extract_strided_slice %27 {offsets = [0, 0], sizes = [8, 8], strides = [1, 1]} : vector<8x32xbf16> to vector<8x8xbf16>
    %29 = vector.extract_strided_slice %27 {offsets = [0, 8], sizes = [8, 8], strides = [1, 1]} : vector<8x32xbf16> to vector<8x8xbf16>
    %30 = vector.extract_strided_slice %27 {offsets = [0, 16], sizes = [8, 8], strides = [1, 1]} : vector<8x32xbf16> to vector<8x8xbf16>
    %31 = vector.extract_strided_slice %27 {offsets = [0, 24], sizes = [8, 8], strides = [1, 1]} : vector<8x32xbf16> to vector<8x8xbf16>
    %32 = vector.shape_cast %28 : vector<8x8xbf16> to vector<1x8x8xbf16>
    %33 = vector.shape_cast %29 : vector<8x8xbf16> to vector<1x8x8xbf16>
    %34 = vector.shape_cast %30 : vector<8x8xbf16> to vector<1x8x8xbf16>
    %35 = vector.shape_cast %31 : vector<8x8xbf16> to vector<1x8x8xbf16>
    %36 = tpu.concatenate %32, %33, %34, %35 in 0 : vector<1x8x8xbf16>, vector<1x8x8xbf16>, vector<1x8x8xbf16>, vector<1x8x8xbf16> -> vector<4x8x8xbf16>
    %37 = vector.extract_strided_slice %17 {offsets = [0, 32], sizes = [8, 32], strides = [1, 1]} : vector<8x64xbf16> to vector<8x32xbf16>
    %38 = vector.extract_strided_slice %37 {offsets = [0, 0], sizes = [8, 8], strides = [1, 1]} : vector<8x32xbf16> to vector<8x8xbf16>
    %39 = vector.extract_strided_slice %37 {offsets = [0, 8], sizes = [8, 8], strides = [1, 1]} : vector<8x32xbf16> to vector<8x8xbf16>
    %40 = vector.extract_strided_slice %37 {offsets = [0, 16], sizes = [8, 8], strides = [1, 1]} : vector<8x32xbf16> to vector<8x8xbf16>
    %41 = vector.extract_strided_slice %37 {offsets = [0, 24], sizes = [8, 8], strides = [1, 1]} : vector<8x32xbf16> to vector<8x8xbf16>
    %42 = vector.shape_cast %38 : vector<8x8xbf16> to vector<1x8x8xbf16>
    %43 = vector.shape_cast %39 : vector<8x8xbf16> to vector<1x8x8xbf16>
    %44 = vector.shape_cast %40 : vector<8x8xbf16> to vector<1x8x8xbf16>
    %45 = vector.shape_cast %41 : vector<8x8xbf16> to vector<1x8x8xbf16>
    %46 = tpu.concatenate %42, %43, %44, %45 in 0 : vector<1x8x8xbf16>, vector<1x8x8xbf16>, vector<1x8x8xbf16>, vector<1x8x8xbf16> -> vector<4x8x8xbf16>
    "tpu.trace_start"() <{level = 10 : i32, message = "hqd,hkd->hqk"}> : () -> ()
    %cst_14 = arith.constant dense<0.000000e+00> : vector<4x8x8xf32>
    %47 = tpu.matmul %26, %36, %cst_14 {dimension_numbers = #tpu.dot_dimension_numbers<[2], [2], [1], [1], [0, 0, 0, 1, 1, 1], [0], [0]>} : vector<4x8x8xbf16>, vector<4x8x8xbf16>, vector<4x8x8xf32> -> vector<4x8x8xf32>
    "tpu.trace_stop"() : () -> ()
    %cst_15 = arith.constant dense<0xFF800000> : vector<4x8xf32>
    %48 = vector.multi_reduction <maximumf>, %47, %cst_15 [2] : vector<4x8x8xf32> to vector<4x8xf32>
    %49 = vector.shape_cast %48 : vector<4x8xf32> to vector<4x8x1xf32>
    %50 = vector.broadcast %49 : vector<4x8x1xf32> to vector<4x8x8xf32>
    %51 = arith.subf %47, %50 : vector<4x8x8xf32>
    %52 = math.exp %51 : vector<4x8x8xf32>
    %cst_16 = arith.constant dense<0.000000e+00> : vector<4x8xf32>
    %53 = vector.multi_reduction <add>, %52, %cst_16 [2] : vector<4x8x8xf32> to vector<4x8xf32>
    %54 = vector.shape_cast %53 : vector<4x8xf32> to vector<4x8x1xf32>
    %55 = tpu.reciprocal %54 {approx = true} : vector<4x8x1xf32> -> vector<4x8x1xf32>
    %56 = vector.broadcast %55 : vector<4x8x1xf32> to vector<4x8x8xf32>
    %57 = arith.mulf %52, %56 : vector<4x8x8xf32>
    %58 = arith.truncf %57 : vector<4x8x8xf32> to vector<4x8x8xbf16>
    "tpu.trace_start"() <{level = 10 : i32, message = "hqk,hkd->hqd"}> : () -> ()
    %cst_17 = arith.constant dense<0.000000e+00> : vector<4x8x8xf32>
    %59 = tpu.matmul %58, %46, %cst_17 {dimension_numbers = #tpu.dot_dimension_numbers<[2], [1], [1], [2], [0, 0, 0, 1, 1, 2], [0], [0]>} : vector<4x8x8xbf16>, vector<4x8x8xbf16>, vector<4x8x8xf32> -> vector<4x8x8xf32>
    "tpu.trace_stop"() : () -> ()
    %60 = arith.truncf %59 : vector<4x8x8xf32> to vector<4x8x8xbf16>
    %61 = vector.extract_strided_slice %60 {offsets = [0, 0, 0], sizes = [1, 8, 8], strides = [1, 1, 1]} : vector<4x8x8xbf16> to vector<1x8x8xbf16>
    %62 = vector.shape_cast %61 : vector<1x8x8xbf16> to vector<8x8xbf16>
    %63 = vector.extract_strided_slice %60 {offsets = [1, 0, 0], sizes = [1, 8, 8], strides = [1, 1, 1]} : vector<4x8x8xbf16> to vector<1x8x8xbf16>
    %64 = vector.shape_cast %63 : vector<1x8x8xbf16> to vector<8x8xbf16>
    %65 = vector.extract_strided_slice %60 {offsets = [2, 0, 0], sizes = [1, 8, 8], strides = [1, 1, 1]} : vector<4x8x8xbf16> to vector<1x8x8xbf16>
    %66 = vector.shape_cast %65 : vector<1x8x8xbf16> to vector<8x8xbf16>
    %67 = vector.extract_strided_slice %60 {offsets = [3, 0, 0], sizes = [1, 8, 8], strides = [1, 1, 1]} : vector<4x8x8xbf16> to vector<1x8x8xbf16>
    %68 = vector.shape_cast %67 : vector<1x8x8xbf16> to vector<8x8xbf16>
    %69 = tpu.concatenate %62, %64, %66, %68 in 1 : vector<8x8xbf16>, vector<8x8xbf16>, vector<8x8xbf16>, vector<8x8xbf16> -> vector<8x32xbf16>
    %c0_18 = arith.constant 0 : index
    %c0_19 = arith.constant 0 : index
    %70 = vector.load %arg8[%c0_18, %c0_19] : memref<32x32xbf16, #tpu.memory_space<vmem>>, vector<32x32xbf16>
    %cst_20 = arith.constant dense<0.000000e+00> : vector<8x32xf32>
    %71 = tpu.matmul %69, %70, %cst_20 {dimension_numbers = #tpu.dot_dimension_numbers<[1], [0], [0], [1], [0, 0, 1, 1], [], []>} : vector<8x32xbf16>, vector<32x32xbf16>, vector<8x32xf32> -> vector<8x32xf32>
    %c0_21 = arith.constant 0 : index
    %c0_22 = arith.constant 0 : index
    %72 = vector.load %arg9[%c0_21, %c0_22] : memref<1x32xf32, #tpu.memory_space<vmem>>, vector<1x32xf32>
    %73 = vector.broadcast %72 : vector<1x32xf32> to vector<8x32xf32>
    %74 = arith.addf %71, %73 : vector<8x32xf32>
    %75 = arith.addf %74, %1 : vector<8x32xf32>
    %cst_23 = arith.constant dense<0.000000e+00> : vector<8xf32>
    %76 = vector.multi_reduction <add>, %75, %cst_23 [1] : vector<8x32xf32> to vector<8xf32>
    %77 = vector.shape_cast %76 : vector<8xf32> to vector<8x1xf32>
    %cst_24 = arith.constant 3.200000e+01 : f32
    %78 = vector.broadcast %cst_24 : f32 to vector<8x1xf32>
    %79 = arith.divf %77, %78 : vector<8x1xf32>
    %80 = vector.broadcast %79 : vector<8x1xf32> to vector<8x32xf32>
    %81 = arith.subf %75, %80 : vector<8x32xf32>
    %82 = vector.broadcast %79 : vector<8x1xf32> to vector<8x32xf32>
    %83 = arith.subf %75, %82 : vector<8x32xf32>
    %84 = arith.mulf %81, %83 : vector<8x32xf32>
    %cst_25 = arith.constant dense<0.000000e+00> : vector<8xf32>
    %85 = vector.multi_reduction <add>, %84, %cst_25 [1] : vector<8x32xf32> to vector<8xf32>
    %86 = vector.shape_cast %85 : vector<8xf32> to vector<8x1xf32>
    %cst_26 = arith.constant 3.200000e+01 : f32
    %87 = vector.broadcast %cst_26 : f32 to vector<8x1xf32>
    %88 = arith.divf %86, %87 : vector<8x1xf32>
    %89 = vector.broadcast %79 : vector<8x1xf32> to vector<8x32xf32>
    %90 = arith.subf %75, %89 : vector<8x32xf32>
    %cst_27 = arith.constant 9.99999974E-6 : f32
    %91 = vector.broadcast %cst_27 : f32 to vector<8x1xf32>
    %92 = arith.addf %88, %91 : vector<8x1xf32>
    %93 = math.rsqrt %92 : vector<8x1xf32>
    %94 = vector.broadcast %93 : vector<8x1xf32> to vector<8x32xf32>
    %95 = arith.mulf %90, %94 : vector<8x32xf32>
    %c0_28 = arith.constant 0 : index
    %c0_29 = arith.constant 0 : index
    %96 = vector.load %arg10[%c0_28, %c0_29] : memref<1x32xf32, #tpu.memory_space<vmem>>, vector<1x32xf32>
    %97 = vector.broadcast %96 : vector<1x32xf32> to vector<8x32xf32>
    %98 = arith.mulf %95, %97 : vector<8x32xf32>
    %c0_30 = arith.constant 0 : index
    %c0_31 = arith.constant 0 : index
    %99 = vector.load %arg11[%c0_30, %c0_31] : memref<1x32xf32, #tpu.memory_space<vmem>>, vector<1x32xf32>
    %100 = vector.broadcast %99 : vector<1x32xf32> to vector<8x32xf32>
    %101 = arith.addf %98, %100 : vector<8x32xf32>
    %102 = arith.truncf %101 : vector<8x32xf32> to vector<8x32xbf16>
    %c0_32 = arith.constant 0 : index
    %c0_33 = arith.constant 0 : index
    %103 = vector.load %arg12[%c0_32, %c0_33] : memref<32x64xbf16, #tpu.memory_space<vmem>>, vector<32x64xbf16>
    %cst_34 = arith.constant dense<0.000000e+00> : vector<8x64xf32>
    %104 = tpu.matmul %102, %103, %cst_34 {dimension_numbers = #tpu.dot_dimension_numbers<[1], [0], [0], [1], [0, 0, 1, 1], [], []>} : vector<8x32xbf16>, vector<32x64xbf16>, vector<8x64xf32> -> vector<8x64xf32>
    %c0_35 = arith.constant 0 : index
    %c0_36 = arith.constant 0 : index
    %105 = vector.load %arg13[%c0_35, %c0_36] : memref<1x64xf32, #tpu.memory_space<vmem>>, vector<1x64xf32>
    %106 = vector.broadcast %105 : vector<1x64xf32> to vector<8x64xf32>
    %107 = arith.addf %104, %106 : vector<8x64xf32>
    %cst_37 = arith.constant 0.000000e+00 : f32
    %108 = vector.broadcast %cst_37 : f32 to vector<8x64xf32>
    %109 = arith.maximumf %107, %108 : vector<8x64xf32>
    %110 = arith.truncf %109 : vector<8x64xf32> to vector<8x64xbf16>
    %c0_38 = arith.constant 0 : index
    %c0_39 = arith.constant 0 : index
    %111 = vector.load %arg14[%c0_38, %c0_39] : memref<64x32xbf16, #tpu.memory_space<vmem>>, vector<64x32xbf16>
    %cst_40 = arith.constant dense<0.000000e+00> : vector<8x32xf32>
    %112 = tpu.matmul %110, %111, %cst_40 {dimension_numbers = #tpu.dot_dimension_numbers<[1], [0], [0], [1], [0, 0, 1, 1], [], []>} : vector<8x64xbf16>, vector<64x32xbf16>, vector<8x32xf32> -> vector<8x32xf32>
    %c0_41 = arith.constant 0 : index
    %c0_42 = arith.constant 0 : index
    %113 = vector.load %arg15[%c0_41, %c0_42] : memref<1x32xf32, #tpu.memory_space<vmem>>, vector<1x32xf32>
    %114 = vector.broadcast %113 : vector<1x32xf32> to vector<8x32xf32>
    %115 = arith.addf %112, %114 : vector<8x32xf32>
    %116 = arith.addf %101, %115 : vector<8x32xf32>
    %cst_43 = arith.constant dense<0.000000e+00> : vector<8xf32>
    %117 = vector.multi_reduction <add>, %116, %cst_43 [1] : vector<8x32xf32> to vector<8xf32>
    %118 = vector.shape_cast %117 : vector<8xf32> to vector<8x1xf32>
    %cst_44 = arith.constant 3.200000e+01 : f32
    %119 = vector.broadcast %cst_44 : f32 to vector<8x1xf32>
    %120 = arith.divf %118, %119 : vector<8x1xf32>
    %121 = vector.broadcast %120 : vector<8x1xf32> to vector<8x32xf32>
    %122 = arith.subf %116, %121 : vector<8x32xf32>
    %123 = vector.broadcast %120 : vector<8x1xf32> to vector<8x32xf32>
    %124 = arith.subf %116, %123 : vector<8x32xf32>
    %125 = arith.mulf %122, %124 : vector<8x32xf32>
    %cst_45 = arith.constant dense<0.000000e+00> : vector<8xf32>
    %126 = vector.multi_reduction <add>, %125, %cst_45 [1] : vector<8x32xf32> to vector<8xf32>
    %127 = vector.shape_cast %126 : vector<8xf32> to vector<8x1xf32>
    %cst_46 = arith.constant 3.200000e+01 : f32
    %128 = vector.broadcast %cst_46 : f32 to vector<8x1xf32>
    %129 = arith.divf %127, %128 : vector<8x1xf32>
    %130 = vector.broadcast %120 : vector<8x1xf32> to vector<8x32xf32>
    %131 = arith.subf %116, %130 : vector<8x32xf32>
    %cst_47 = arith.constant 9.99999974E-6 : f32
    %132 = vector.broadcast %cst_47 : f32 to vector<8x1xf32>
    %133 = arith.addf %129, %132 : vector<8x1xf32>
    %134 = math.rsqrt %133 : vector<8x1xf32>
    %135 = vector.broadcast %134 : vector<8x1xf32> to vector<8x32xf32>
    %136 = arith.mulf %131, %135 : vector<8x32xf32>
    %c0_48 = arith.constant 0 : index
    %c0_49 = arith.constant 0 : index
    %137 = vector.load %arg16[%c0_48, %c0_49] : memref<1x32xf32, #tpu.memory_space<vmem>>, vector<1x32xf32>
    %138 = vector.broadcast %137 : vector<1x32xf32> to vector<8x32xf32>
    %139 = arith.mulf %136, %138 : vector<8x32xf32>
    %c0_50 = arith.constant 0 : index
    %c0_51 = arith.constant 0 : index
    %140 = vector.load %arg17[%c0_50, %c0_51] : memref<1x32xf32, #tpu.memory_space<vmem>>, vector<1x32xf32>
    %141 = vector.broadcast %140 : vector<1x32xf32> to vector<8x32xf32>
    %142 = arith.addf %139, %141 : vector<8x32xf32>
    %c0_52 = arith.constant 0 : index
    %c0_53 = arith.constant 0 : index
    %c0_54 = arith.constant 0 : index
    %143 = vector.load %arg18[%c0_52, %c0_53, %c0_54] : memref<1x8x32xf32, #tpu.memory_space<vmem>>, vector<1x8x32xf32>
    %144 = vector.shape_cast %143 : vector<1x8x32xf32> to vector<8x32xf32>
    %145 = vector.shape_cast %142 : vector<8x32xf32> to vector<1x8x32xf32>
    tpu.vector_store %arg18[%c0_52, %c0_53, %c0_54], %145 {strides = array<i32>} : memref<1x8x32xf32, #tpu.memory_space<vmem>>, vector<1x8x32xf32>,
    return
  }
  func.func @transform_0(%arg0: i32, %arg1: i32) -> (i32, i32, i32) {
    %c0_i32 = arith.constant 0 : i32
    %c0_i32_0 = arith.constant 0 : i32
    return %arg0, %arg1, %c0_i32 : i32, i32, i32
  }
  func.func @transform_1(%arg0: i32, %arg1: i32) -> (i32, i32, i32) {
    %c0_i32 = arith.constant 0 : i32
    %c0_i32_0 = arith.constant 0 : i32
    %c0_i32_1 = arith.constant 0 : i32
    return %arg0, %c0_i32, %c0_i32_0 : i32, i32, i32
  }
  func.func @transform_2(%arg0: i32, %arg1: i32) -> (i32, i32) {
    %c0_i32 = arith.constant 0 : i32
    %c0_i32_0 = arith.constant 0 : i32
    %c0_i32_1 = arith.constant 0 : i32
    return %c0_i32, %c0_i32_0 : i32, i32
  }
  func.func @transform_3(%arg0: i32, %arg1: i32) -> (i32, i32) {
    %c0_i32 = arith.constant 0 : i32
    %c0_i32_0 = arith.constant 0 : i32
    %c0_i32_1 = arith.constant 0 : i32
    return %c0_i32, %c0_i32_0 : i32, i32
  }
  func.func @transform_4(%arg0: i32, %arg1: i32) -> (i32, i32) {
    %c0_i32 = arith.constant 0 : i32
    %c0_i32_0 = arith.constant 0 : i32
    %c0_i32_1 = arith.constant 0 : i32
    return %c0_i32, %c0_i32_0 : i32, i32
  }
  func.func @transform_5(%arg0: i32, %arg1: i32) -> (i32, i32) {
    %c0_i32 = arith.constant 0 : i32
    %c0_i32_0 = arith.constant 0 : i32
    %c0_i32_1 = arith.constant 0 : i32
    return %c0_i32, %c0_i32_0 : i32, i32
  }
  func.func @transform_6(%arg0: i32, %arg1: i32) -> (i32, i32) {
    %c0_i32 = arith.constant 0 : i32
    %c0_i32_0 = arith.constant 0 : i32
    %c0_i32_1 = arith.constant 0 : i32
    return %c0_i32, %c0_i32_0 : i32, i32
  }
  func.func @transform_7(%arg0: i32, %arg1: i32) -> (i32, i32) {
    %c0_i32 = arith.constant 0 : i32
    %c0_i32_0 = arith.constant 0 : i32
    %c0_i32_1 = arith.constant 0 : i32
    return %c0_i32, %c0_i32_0 : i32, i32
  }
  func.func @transform_8(%arg0: i32, %arg1: i32) -> (i32, i32) {
    %c0_i32 = arith.constant 0 : i32
    %c0_i32_0 = arith.constant 0 : i32
    %c0_i32_1 = arith.constant 0 : i32
    return %c0_i32, %c0_i32_0 : i32, i32
  }
  func.func @transform_9(%arg0: i32, %arg1: i32) -> (i32, i32) {
    %c0_i32 = arith.constant 0 : i32
    %c0_i32_0 = arith.constant 0 : i32
    %c0_i32_1 = arith.constant 0 : i32
    return %c0_i32, %c0_i32_0 : i32, i32
  }
  func.func @transform_10(%arg0: i32, %arg1: i32) -> (i32, i32) {
    %c0_i32 = arith.constant 0 : i32
    %c0_i32_0 = arith.constant 0 : i32
    %c0_i32_1 = arith.constant 0 : i32
    return %c0_i32, %c0_i32_0 : i32, i32
  }
  func.func @transform_11(%arg0: i32, %arg1: i32) -> (i32, i32) {
    %c0_i32 = arith.constant 0 : i32
    %c0_i32_0 = arith.constant 0 : i32
    %c0_i32_1 = arith.constant 0 : i32
    return %c0_i32, %c0_i32_0 : i32, i32
  }
  func.func @transform_12(%arg0: i32, %arg1: i32) -> (i32, i32) {
    %c0_i32 = arith.constant 0 : i32
    %c0_i32_0 = arith.constant 0 : i32
    %c0_i32_1 = arith.constant 0 : i32
    return %c0_i32, %c0_i32_0 : i32, i32
  }
  func.func @transform_13(%arg0: i32, %arg1: i32) -> (i32, i32) {
    %c0_i32 = arith.constant 0 : i32
    %c0_i32_0 = arith.constant 0 : i32
    %c0_i32_1 = arith.constant 0 : i32
    return %c0_i32, %c0_i32_0 : i32, i32
  }
  func.func @transform_14(%arg0: i32, %arg1: i32) -> (i32, i32) {
    %c0_i32 = arith.constant 0 : i32
    %c0_i32_0 = arith.constant 0 : i32
    %c0_i32_1 = arith.constant 0 : i32
    return %c0_i32, %c0_i32_0 : i32, i32
  }
  func.func @transform_15(%arg0: i32, %arg1: i32) -> (i32, i32) {
    %c0_i32 = arith.constant 0 : i32
    %c0_i32_0 = arith.constant 0 : i32
    %c0_i32_1 = arith.constant 0 : i32
    return %c0_i32, %c0_i32_0 : i32, i32
  }
  func.func @transform_16(%arg0: i32, %arg1: i32) -> (i32, i32, i32) {
    %c0_i32 = arith.constant 0 : i32
    %c0_i32_0 = arith.constant 0 : i32
    return %arg0, %arg1, %c0_i32 : i32, i32, i32
  }
}

module attributes {stable_mosaic.version = 11 : i64} {
  func.func @_encoder_kernel(%arg0: i32, %arg1: i32, %arg2: memref<1x8x32xf32, #tpu.memory_space<vmem>>, %arg3: memref<1x8x32xf32, #tpu.memory_space<vmem>>, %arg4: memref<32x32xbf16, #tpu.memory_space<vmem>>, %arg5: memref<1x32xf32, #tpu.memory_space<vmem>>, %arg6: memref<32x64xbf16, #tpu.memory_space<vmem>>, %arg7: memref<1x64xf32, #tpu.memory_space<vmem>>, %arg8: memref<32x32xbf16, #tpu.memory_space<vmem>>, %arg9: memref<1x32xf32, #tpu.memory_space<vmem>>, %arg10: memref<1x32xf32, #tpu.memory_space<vmem>>, %arg11: memref<1x32xf32, #tpu.memory_space<vmem>>, %arg12: memref<32x64xbf16, #tpu.memory_space<vmem>>, %arg13: memref<1x64xf32, #tpu.memory_space<vmem>>, %arg14: memref<64x32xbf16, #tpu.memory_space<vmem>>, %arg15: memref<1x32xf32, #tpu.memory_space<vmem>>, %arg16: memref<1x32xf32, #tpu.memory_space<vmem>>, %arg17: memref<1x32xf32, #tpu.memory_space<vmem>>, %arg18: memref<1x8x32xf32, #tpu.memory_space<vmem>>) attributes {dimension_semantics = [#tpu.dimension_semantics<parallel>, #tpu.dimension_semantics<parallel>], iteration_bounds = array<i64: 2, 1>, scalar_prefetch = 0 : i64, scratch_operands = 0 : i64, tpu.core_type = #tpu.core_type<tc>, window_params = [{transform_indices = @transform_0, window_bounds = array<i64: 1, 8, 32>}, {transform_indices = @transform_1, window_bounds = array<i64: 1, 8, 32>}, {pipeline_mode = #tpu.pipeline_mode<synchronous>, transform_indices = @transform_2, window_bounds = array<i64: 32, 32>}, {pipeline_mode = #tpu.pipeline_mode<synchronous>, transform_indices = @transform_3, window_bounds = array<i64: 1, 32>}, {pipeline_mode = #tpu.pipeline_mode<synchronous>, transform_indices = @transform_4, window_bounds = array<i64: 32, 64>}, {pipeline_mode = #tpu.pipeline_mode<synchronous>, transform_indices = @transform_5, window_bounds = array<i64: 1, 64>}, {pipeline_mode = #tpu.pipeline_mode<synchronous>, transform_indices = @transform_6, window_bounds = array<i64: 32, 32>}, {pipeline_mode = #tpu.pipeline_mode<synchronous>, transform_indices = @transform_7, window_bounds = array<i64: 1, 32>}, {pipeline_mode = #tpu.pipeline_mode<synchronous>, transform_indices = @transform_8, window_bounds = array<i64: 1, 32>}, {pipeline_mode = #tpu.pipeline_mode<synchronous>, transform_indices = @transform_9, window_bounds = array<i64: 1, 32>}, {pipeline_mode = #tpu.pipeline_mode<synchronous>, transform_indices = @transform_10, window_bounds = array<i64: 32, 64>}, {pipeline_mode = #tpu.pipeline_mode<synchronous>, transform_indices = @transform_11, window_bounds = array<i64: 1, 64>}, {pipeline_mode = #tpu.pipeline_mode<synchronous>, transform_indices = @transform_12, window_bounds = array<i64: 64, 32>}, {pipeline_mode = #tpu.pipeline_mode<synchronous>, transform_indices = @transform_13, window_bounds = array<i64: 1, 32>}, {pipeline_mode = #tpu.pipeline_mode<synchronous>, transform_indices = @transform_14, window_bounds = array<i64: 1, 32>}, {pipeline_mode = #tpu.pipeline_mode<synchronous>, transform_indices = @transform_15, window_bounds = array<i64: 1, 32>}, {transform_indices = @transform_16, window_bounds = array<i64: 1, 8, 32>}]} {
    %c0 = arith.constant 0 : index
    %c0_0 = arith.constant 0 : index
    %c0_1 = arith.constant 0 : index
    %0 = vector.load %arg2[%c0, %c0_0, %c0_1] : memref<1x8x32xf32, #tpu.memory_space<vmem>>, vector<1x8x32xf32>
    %1 = vector.shape_cast %0 : vector<1x8x32xf32> to vector<8x32xf32>
    %2 = arith.truncf %1 : vector<8x32xf32> to vector<8x32xbf16>
    %c0_2 = arith.constant 0 : index
    %c0_3 = arith.constant 0 : index
    %c0_4 = arith.constant 0 : index
    %3 = vector.load %arg3[%c0_2, %c0_3, %c0_4] : memref<1x8x32xf32, #tpu.memory_space<vmem>>, vector<1x8x32xf32>
    %4 = vector.shape_cast %3 : vector<1x8x32xf32> to vector<8x32xf32>
    %5 = arith.truncf %4 : vector<8x32xf32> to vector<8x32xbf16>
    %c0_5 = arith.constant 0 : index
    %c0_6 = arith.constant 0 : index
    %6 = vector.load %arg4[%c0_5, %c0_6] : memref<32x32xbf16, #tpu.memory_space<vmem>>, vector<32x32xbf16>
    %cst = arith.constant dense<0.000000e+00> : vector<8x32xf32>
    %7 = tpu.matmul %2, %6, %cst {dimension_numbers = #tpu.dot_dimension_numbers<[1], [0], [0], [1], [0, 0, 1, 1], [], []>} : vector<8x32xbf16>, vector<32x32xbf16>, vector<8x32xf32> -> vector<8x32xf32>
    %c0_7 = arith.constant 0 : index
    %c0_8 = arith.constant 0 : index
    %8 = vector.load %arg5[%c0_7, %c0_8] : memref<1x32xf32, #tpu.memory_space<vmem>>, vector<1x32xf32>
    %9 = vector.broadcast %8 : vector<1x32xf32> to vector<8x32xf32>
    %10 = arith.addf %7, %9 : vector<8x32xf32>
    %11 = arith.truncf %10 : vector<8x32xf32> to vector<8x32xbf16>
    %c0_9 = arith.constant 0 : index
    %c0_10 = arith.constant 0 : index
    %12 = vector.load %arg6[%c0_9, %c0_10] : memref<32x64xbf16, #tpu.memory_space<vmem>>, vector<32x64xbf16>
    %cst_11 = arith.constant dense<0.000000e+00> : vector<8x64xf32>
    %13 = tpu.matmul %5, %12, %cst_11 {dimension_numbers = #tpu.dot_dimension_numbers<[1], [0], [0], [1], [0, 0, 1, 1], [], []>} : vector<8x32xbf16>, vector<32x64xbf16>, vector<8x64xf32> -> vector<8x64xf32>
    %c0_12 = arith.constant 0 : index
    %c0_13 = arith.constant 0 : index
    %14 = vector.load %arg7[%c0_12, %c0_13] : memref<1x64xf32, #tpu.memory_space<vmem>>, vector<1x64xf32>
    %15 = vector.broadcast %14 : vector<1x64xf32> to vector<8x64xf32>
    %16 = arith.addf %13, %15 : vector<8x64xf32>
    %17 = arith.truncf %16 : vector<8x64xf32> to vector<8x64xbf16>
    %18 = vector.extract_strided_slice %11 {offsets = [0, 0], sizes = [8, 8], strides = [1, 1]} : vector<8x32xbf16> to vector<8x8xbf16>
    %19 = vector.extract_strided_slice %11 {offsets = [0, 8], sizes = [8, 8], strides = [1, 1]} : vector<8x32xbf16> to vector<8x8xbf16>
    %20 = vector.extract_strided_slice %11 {offsets = [0, 16], sizes = [8, 8], strides = [1, 1]} : vector<8x32xbf16> to vector<8x8xbf16>
    %21 = vector.extract_strided_slice %11 {offsets = [0, 24], sizes = [8, 8], strides = [1, 1]} : vector<8x32xbf16> to vector<8x8xbf16>
    %22 = vector.shape_cast %18 : vector<8x8xbf16> to vector<1x8x8xbf16>
    %23 = vector.shape_cast %19 : vector<8x8xbf16> to vector<1x8x8xbf16>
    %24 = vector.shape_cast %20 : vector<8x8xbf16> to vector<1x8x8xbf16>
    %25 = vector.shape_cast %21 : vector<8x8xbf16> to vector<1x8x8xbf16>
    %26 = tpu.concatenate %22, %23, %24, %25 in 0 : vector<1x8x8xbf16>, vector<1x8x8xbf16>, vector<1x8x8xbf16>, vector<1x8x8xbf16> -> vector<4x8x8xbf16>
    %27 = vector.extract_strided_slice %17 {offsets = [0, 0], sizes = [8, 32], strides = [1, 1]} : vector<8x64xbf16> to vector<8x32xbf16>
    %28 = vector.extract_strided_slice %27 {offsets = [0, 0], sizes = [8, 8], strides = [1, 1]} : vector<8x32xbf16> to vector<8x8xbf16>
    %29 = vector.extract_strided_slice %27 {offsets = [0, 8], sizes = [8, 8], strides = [1, 1]} : vector<8x32xbf16> to vector<8x8xbf16>
    %30 = vector.extract_strided_slice %27 {offsets = [0, 16], sizes = [8, 8], strides = [1, 1]} : vector<8x32xbf16> to vector<8x8xbf16>
    %31 = vector.extract_strided_slice %27 {offsets = [0, 24], sizes = [8, 8], strides = [1, 1]} : vector<8x32xbf16> to vector<8x8xbf16>
    %32 = vector.shape_cast %28 : vector<8x8xbf16> to vector<1x8x8xbf16>
    %33 = vector.shape_cast %29 : vector<8x8xbf16> to vector<1x8x8xbf16>
    %34 = vector.shape_cast %30 : vector<8x8xbf16> to vector<1x8x8xbf16>
    %35 = vector.shape_cast %31 : vector<8x8xbf16> to vector<1x8x8xbf16>
    %36 = tpu.concatenate %32, %33, %34, %35 in 0 : vector<1x8x8xbf16>, vector<1x8x8xbf16>, vector<1x8x8xbf16>, vector<1x8x8xbf16> -> vector<4x8x8xbf16>
    %37 = vector.extract_strided_slice %17 {offsets = [0, 32], sizes = [8, 32], strides = [1, 1]} : vector<8x64xbf16> to vector<8x32xbf16>
    %38 = vector.extract_strided_slice %37 {offsets = [0, 0], sizes = [8, 8], strides = [1, 1]} : vector<8x32xbf16> to vector<8x8xbf16>
    %39 = vector.extract_strided_slice %37 {offsets = [0, 8], sizes = [8, 8], strides = [1, 1]} : vector<8x32xbf16> to vector<8x8xbf16>
    %40 = vector.extract_strided_slice %37 {offsets = [0, 16], sizes = [8, 8], strides = [1, 1]} : vector<8x32xbf16> to vector<8x8xbf16>
    %41 = vector.extract_strided_slice %37 {offsets = [0, 24], sizes = [8, 8], strides = [1, 1]} : vector<8x32xbf16> to vector<8x8xbf16>
    %42 = vector.shape_cast %38 : vector<8x8xbf16> to vector<1x8x8xbf16>
    %43 = vector.shape_cast %39 : vector<8x8xbf16> to vector<1x8x8xbf16>
    %44 = vector.shape_cast %40 : vector<8x8xbf16> to vector<1x8x8xbf16>
    %45 = vector.shape_cast %41 : vector<8x8xbf16> to vector<1x8x8xbf16>
    %46 = tpu.concatenate %42, %43, %44, %45 in 0 : vector<1x8x8xbf16>, vector<1x8x8xbf16>, vector<1x8x8xbf16>, vector<1x8x8xbf16> -> vector<4x8x8xbf16>
    "tpu.trace_start"() <{level = 10 : i32, message = "hqd,hkd->hqk"}> : () -> ()
    %cst_14 = arith.constant dense<0.000000e+00> : vector<4x8x8xf32>
    %47 = tpu.matmul %26, %36, %cst_14 {dimension_numbers = #tpu.dot_dimension_numbers<[2], [2], [1], [1], [0, 0, 0, 1, 1, 1], [0], [0]>} : vector<4x8x8xbf16>, vector<4x8x8xbf16>, vector<4x8x8xf32> -> vector<4x8x8xf32>
    "tpu.trace_stop"() : () -> ()
    %cst_15 = arith.constant dense<0xFF800000> : vector<4x8xf32>
    %48 = vector.multi_reduction <maximumf>, %47, %cst_15 [2] : vector<4x8x8xf32> to vector<4x8xf32>
    %49 = vector.shape_cast %48 : vector<4x8xf32> to vector<4x8x1xf32>
    %50 = vector.broadcast %49 : vector<4x8x1xf32> to vector<4x8x8xf32>
    %51 = arith.subf %47, %50 : vector<4x8x8xf32>
    %52 = math.exp %51 : vector<4x8x8xf32>
    %cst_16 = arith.constant dense<0.000000e+00> : vector<4x8xf32>
    %53 = vector.multi_reduction <add>, %52, %cst_16 [2] : vector<4x8x8xf32> to vector<4x8xf32>
    %54 = vector.shape_cast %53 : vector<4x8xf32> to vector<4x8x1xf32>
    %55 = tpu.reciprocal %54 {approx = true} : vector<4x8x1xf32> -> vector<4x8x1xf32>
    %56 = vector.broadcast %55 : vector<4x8x1xf32> to vector<4x8x8xf32>
    %57 = arith.mulf %52, %56 : vector<4x8x8xf32>
    %58 = arith.truncf %57 : vector<4x8x8xf32> to vector<4x8x8xbf16>
    "tpu.trace_start"() <{level = 10 : i32, message = "hqk,hkd->hqd"}> : () -> ()
    %cst_17 = arith.constant dense<0.000000e+00> : vector<4x8x8xf32>
    %59 = tpu.matmul %58, %46, %cst_17 {dimension_numbers = #tpu.dot_dimension_numbers<[2], [1], [1], [2], [0, 0, 0, 1, 1, 2], [0], [0]>} : vector<4x8x8xbf16>, vector<4x8x8xbf16>, vector<4x8x8xf32> -> vector<4x8x8xf32>
    "tpu.trace_stop"() : () -> ()
    %60 = arith.truncf %59 : vector<4x8x8xf32> to vector<4x8x8xbf16>
    %61 = vector.extract_strided_slice %60 {offsets = [0, 0, 0], sizes = [1, 8, 8], strides = [1, 1, 1]} : vector<4x8x8xbf16> to vector<1x8x8xbf16>
    %62 = vector.shape_cast %61 : vector<1x8x8xbf16> to vector<8x8xbf16>
    %63 = vector.extract_strided_slice %60 {offsets = [1, 0, 0], sizes = [1, 8, 8], strides = [1, 1, 1]} : vector<4x8x8xbf16> to vector<1x8x8xbf16>
    %64 = vector.shape_cast %63 : vector<1x8x8xbf16> to vector<8x8xbf16>
    %65 = vector.extract_strided_slice %60 {offsets = [2, 0, 0], sizes = [1, 8, 8], strides = [1, 1, 1]} : vector<4x8x8xbf16> to vector<1x8x8xbf16>
    %66 = vector.shape_cast %65 : vector<1x8x8xbf16> to vector<8x8xbf16>
    %67 = vector.extract_strided_slice %60 {offsets = [3, 0, 0], sizes = [1, 8, 8], strides = [1, 1, 1]} : vector<4x8x8xbf16> to vector<1x8x8xbf16>
    %68 = vector.shape_cast %67 : vector<1x8x8xbf16> to vector<8x8xbf16>
    %69 = tpu.concatenate %62, %64, %66, %68 in 1 : vector<8x8xbf16>, vector<8x8xbf16>, vector<8x8xbf16>, vector<8x8xbf16> -> vector<8x32xbf16>
    %c0_18 = arith.constant 0 : index
    %c0_19 = arith.constant 0 : index
    %70 = vector.load %arg8[%c0_18, %c0_19] : memref<32x32xbf16, #tpu.memory_space<vmem>>, vector<32x32xbf16>
    %cst_20 = arith.constant dense<0.000000e+00> : vector<8x32xf32>
    %71 = tpu.matmul %69, %70, %cst_20 {dimension_numbers = #tpu.dot_dimension_numbers<[1], [0], [0], [1], [0, 0, 1, 1], [], []>} : vector<8x32xbf16>, vector<32x32xbf16>, vector<8x32xf32> -> vector<8x32xf32>
    %c0_21 = arith.constant 0 : index
    %c0_22 = arith.constant 0 : index
    %72 = vector.load %arg9[%c0_21, %c0_22] : memref<1x32xf32, #tpu.memory_space<vmem>>, vector<1x32xf32>
    %73 = vector.broadcast %72 : vector<1x32xf32> to vector<8x32xf32>
    %74 = arith.addf %71, %73 : vector<8x32xf32>
    %75 = arith.addf %74, %1 : vector<8x32xf32>
    %cst_23 = arith.constant dense<0.000000e+00> : vector<8xf32>
    %76 = vector.multi_reduction <add>, %75, %cst_23 [1] : vector<8x32xf32> to vector<8xf32>
    %77 = vector.shape_cast %76 : vector<8xf32> to vector<8x1xf32>
    %cst_24 = arith.constant 3.200000e+01 : f32
    %78 = vector.broadcast %cst_24 : f32 to vector<8x1xf32>
    %79 = arith.divf %77, %78 : vector<8x1xf32>
    %80 = vector.broadcast %79 : vector<8x1xf32> to vector<8x32xf32>
    %81 = arith.subf %75, %80 : vector<8x32xf32>
    %82 = vector.broadcast %79 : vector<8x1xf32> to vector<8x32xf32>
    %83 = arith.subf %75, %82 : vector<8x32xf32>
    %84 = arith.mulf %81, %83 : vector<8x32xf32>
    %cst_25 = arith.constant dense<0.000000e+00> : vector<8xf32>
    %85 = vector.multi_reduction <add>, %84, %cst_25 [1] : vector<8x32xf32> to vector<8xf32>
    %86 = vector.shape_cast %85 : vector<8xf32> to vector<8x1xf32>
    %cst_26 = arith.constant 3.200000e+01 : f32
    %87 = vector.broadcast %cst_26 : f32 to vector<8x1xf32>
    %88 = arith.divf %86, %87 : vector<8x1xf32>
    %89 = vector.broadcast %79 : vector<8x1xf32> to vector<8x32xf32>
    %90 = arith.subf %75, %89 : vector<8x32xf32>
    %cst_27 = arith.constant 9.99999974E-6 : f32
    %91 = vector.broadcast %cst_27 : f32 to vector<8x1xf32>
    %92 = arith.addf %88, %91 : vector<8x1xf32>
    %93 = math.rsqrt %92 : vector<8x1xf32>
    %94 = vector.broadcast %93 : vector<8x1xf32> to vector<8x32xf32>
    %95 = arith.mulf %90, %94 : vector<8x32xf32>
    %c0_28 = arith.constant 0 : index
    %c0_29 = arith.constant 0 : index
    %96 = vector.load %arg10[%c0_28, %c0_29] : memref<1x32xf32, #tpu.memory_space<vmem>>, vector<1x32xf32>
    %97 = vector.broadcast %96 : vector<1x32xf32> to vector<8x32xf32>
    %98 = arith.mulf %95, %97 : vector<8x32xf32>
    %c0_30 = arith.constant 0 : index
    %c0_31 = arith.constant 0 : index
    %99 = vector.load %arg11[%c0_30, %c0_31] : memref<1x32xf32, #tpu.memory_space<vmem>>, vector<1x32xf32>
    %100 = vector.broadcast %99 : vector<1x32xf32> to vector<8x32xf32>
    %101 = arith.addf %98, %100 : vector<8x32xf32>
    %102 = arith.truncf %101 : vector<8x32xf32> to vector<8x32xbf16>
    %c0_32 = arith.constant 0 : index
    %c0_33 = arith.constant 0 : index
    %103 = vector.load %arg12[%c0_32, %c0_33] : memref<32x64xbf16, #tpu.memory_space<vmem>>, vector<32x64xbf16>
    %cst_34 = arith.constant dense<0.000000e+00> : vector<8x64xf32>
    %104 = tpu.matmul %102, %103, %cst_34 {dimension_numbers = #tpu.dot_dimension_numbers<[1], [0], [0], [1], [0, 0, 1, 1], [], []>} : vector<8x32xbf16>, vector<32x64xbf16>, vector<8x64xf32> -> vector<8x64xf32>
    %c0_35 = arith.constant 0 : index
    %c0_36 = arith.constant 0 : index
    %105 = vector.load %arg13[%c0_35, %c0_36] : memref<1x64xf32, #tpu.memory_space<vmem>>, vector<1x64xf32>
    %106 = vector.broadcast %105 : vector<1x64xf32> to vector<8x64xf32>
    %107 = arith.addf %104, %106 : vector<8x64xf32>
    %cst_37 = arith.constant 0.000000e+00 : f32
    %108 = vector.broadcast %cst_37 : f32 to vector<8x64xf32>
    %109 = arith.maximumf %107, %108 : vector<8x64xf32>
    %110 = arith.truncf %109 : vector<8x64xf32> to vector<8x64xbf16>
    %c0_38 = arith.constant 0 : index
    %c0_39 = arith.constant 0 : index
    %111 = vector.load %arg14[%c0_38, %c0_39] : memref<64x32xbf16, #tpu.memory_space<vmem>>, vector<64x32xbf16>
    %cst_40 = arith.constant dense<0.000000e+00> : vector<8x32xf32>
    %112 = tpu.matmul %110, %111, %cst_40 {dimension_numbers = #tpu.dot_dimension_numbers<[1], [0], [0], [1], [0, 0, 1, 1], [], []>} : vector<8x64xbf16>, vector<64x32xbf16>, vector<8x32xf32> -> vector<8x32xf32>
    %c0_41 = arith.constant 0 : index
    %c0_42 = arith.constant 0 : index
    %113 = vector.load %arg15[%c0_41, %c0_42] : memref<1x32xf32, #tpu.memory_space<vmem>>, vector<1x32xf32>
    %114 = vector.broadcast %113 : vector<1x32xf32> to vector<8x32xf32>
    %115 = arith.addf %112, %114 : vector<8x32xf32>
    %116 = arith.addf %101, %115 : vector<8x32xf32>
    %cst_43 = arith.constant dense<0.000000e+00> : vector<8xf32>
    %117 = vector.multi_reduction <add>, %116, %cst_43 [1] : vector<8x32xf32> to vector<8xf32>
    %118 = vector.shape_cast %117 : vector<8xf32> to vector<8x1xf32>
    %cst_44 = arith.constant 3.200000e+01 : f32
    %119 = vector.broadcast %cst_44 : f32 to vector<8x1xf32>
    %120 = arith.divf %118, %119 : vector<8x1xf32>
    %121 = vector.broadcast %120 : vector<8x1xf32> to vector<8x32xf32>
    %122 = arith.subf %116, %121 : vector<8x32xf32>
    %123 = vector.broadcast %120 : vector<8x1xf32> to vector<8x32xf32>
    %124 = arith.subf %116, %123 : vector<8x32xf32>
    %125 = arith.mulf %122, %124 : vector<8x32xf32>
    %cst_45 = arith.constant dense<0.000000e+00> : vector<8xf32>
    %126 = vector.multi_reduction <add>, %125, %cst_45 [1] : vector<8x32xf32> to vector<8xf32>
    %127 = vector.shape_cast %126 : vector<8xf32> to vector<8x1xf32>
    %cst_46 = arith.constant 3.200000e+01 : f32
    %128 = vector.broadcast %cst_46 : f32 to vector<8x1xf32>
    %129 = arith.divf %127, %128 : vector<8x1xf32>
    %130 = vector.broadcast %120 : vector<8x1xf32> to vector<8x32xf32>
    %131 = arith.subf %116, %130 : vector<8x32xf32>
    %cst_47 = arith.constant 9.99999974E-6 : f32
    %132 = vector.broadcast %cst_47 : f32 to vector<8x1xf32>
    %133 = arith.addf %129, %132 : vector<8x1xf32>
    %134 = math.rsqrt %133 : vector<8x1xf32>
    %135 = vector.broadcast %134 : vector<8x1xf32> to vector<8x32xf32>
    %136 = arith.mulf %131, %135 : vector<8x32xf32>
    %c0_48 = arith.constant 0 : index
    %c0_49 = arith.constant 0 : index
    %137 = vector.load %arg16[%c0_48, %c0_49] : memref<1x32xf32, #tpu.memory_space<vmem>>, vector<1x32xf32>
    %138 = vector.broadcast %137 : vector<1x32xf32> to vector<8x32xf32>
    %139 = arith.mulf %136, %138 : vector<8x32xf32>
    %c0_50 = arith.constant 0 : index
    %c0_51 = arith.constant 0 : index
    %140 = vector.load %arg17[%c0_50, %c0_51] : memref<1x32xf32, #tpu.memory_space<vmem>>, vector<1x32xf32>
    %141 = vector.broadcast %140 : vector<1x32xf32> to vector<8x32xf32>
    %142 = arith.addf %139, %141 : vector<8x32xf32>
    %c0_52 = arith.constant 0 : index
    %c0_53 = arith.constant 0 : index
    %c0_54 = arith.constant 0 : index
    %143 = vector.load %arg18[%c0_52, %c0_53, %c0_54] : memref<1x8x32xf32, #tpu.memory_space<vmem>>, vector<1x8x32xf32>
    %144 = vector.shape_cast %143 : vector<1x8x32xf32> to vector<8x32xf32>
    %145 = vector.shape_cast %142 : vector<8x32xf32> to vector<1x8x32xf32>
    tpu.vector_store %arg18[%c0_52, %c0_53, %c0_54], %145 {strides = array<i32>} : memref<1x8x32xf32, #tpu.memory_space<vmem>>, vector<1x8x32xf32>,
    return
  }
  func.func @transform_0(%arg0: i32, %arg1: i32) -> (i32, i32, i32) {
    %c0_i32 = arith.constant 0 : i32
    %c0_i32_0 = arith.constant 0 : i32
    return %arg0, %arg1, %c0_i32 : i32, i32, i32
  }
  func.func @transform_1(%arg0: i32, %arg1: i32) -> (i32, i32, i32) {
    %c0_i32 = arith.constant 0 : i32
    %c0_i32_0 = arith.constant 0 : i32
    %c0_i32_1 = arith.constant 0 : i32
    return %arg0, %c0_i32, %c0_i32_0 : i32, i32, i32
  }
  func.func @transform_2(%arg0: i32, %arg1: i32) -> (i32, i32) {
    %c0_i32 = arith.constant 0 : i32
    %c0_i32_0 = arith.constant 0 : i32
    %c0_i32_1 = arith.constant 0 : i32
    return %c0_i32, %c0_i32_0 : i32, i32
  }
  func.func @transform_3(%arg0: i32, %arg1: i32) -> (i32, i32) {
    %c0_i32 = arith.constant 0 : i32
    %c0_i32_0 = arith.constant 0 : i32
    %c0_i32_1 = arith.constant 0 : i32
    return %c0_i32, %c0_i32_0 : i32, i32
  }
  func.func @transform_4(%arg0: i32, %arg1: i32) -> (i32, i32) {
    %c0_i32 = arith.constant 0 : i32
    %c0_i32_0 = arith.constant 0 : i32
    %c0_i32_1 = arith.constant 0 : i32
    return %c0_i32, %c0_i32_0 : i32, i32
  }
  func.func @transform_5(%arg0: i32, %arg1: i32) -> (i32, i32) {
    %c0_i32 = arith.constant 0 : i32
    %c0_i32_0 = arith.constant 0 : i32
    %c0_i32_1 = arith.constant 0 : i32
    return %c0_i32, %c0_i32_0 : i32, i32
  }
  func.func @transform_6(%arg0: i32, %arg1: i32) -> (i32, i32) {
    %c0_i32 = arith.constant 0 : i32
    %c0_i32_0 = arith.constant 0 : i32
    %c0_i32_1 = arith.constant 0 : i32
    return %c0_i32, %c0_i32_0 : i32, i32
  }
  func.func @transform_7(%arg0: i32, %arg1: i32) -> (i32, i32) {
    %c0_i32 = arith.constant 0 : i32
    %c0_i32_0 = arith.constant 0 : i32
    %c0_i32_1 = arith.constant 0 : i32
    return %c0_i32, %c0_i32_0 : i32, i32
  }
  func.func @transform_8(%arg0: i32, %arg1: i32) -> (i32, i32) {
    %c0_i32 = arith.constant 0 : i32
    %c0_i32_0 = arith.constant 0 : i32
    %c0_i32_1 = arith.constant 0 : i32
    return %c0_i32, %c0_i32_0 : i32, i32
  }
  func.func @transform_9(%arg0: i32, %arg1: i32) -> (i32, i32) {
    %c0_i32 = arith.constant 0 : i32
    %c0_i32_0 = arith.constant 0 : i32
    %c0_i32_1 = arith.constant 0 : i32
    return %c0_i32, %c0_i32_0 : i32, i32
  }
  func.func @transform_10(%arg0: i32, %arg1: i32) -> (i32, i32) {
    %c0_i32 = arith.constant 0 : i32
    %c0_i32_0 = arith.constant 0 : i32
    %c0_i32_1 = arith.constant 0 : i32
    return %c0_i32, %c0_i32_0 : i32, i32
  }
  func.func @transform_11(%arg0: i32, %arg1: i32) -> (i32, i32) {
    %c0_i32 = arith.constant 0 : i32
    %c0_i32_0 = arith.constant 0 : i32
    %c0_i32_1 = arith.constant 0 : i32
    return %c0_i32, %c0_i32_0 : i32, i32
  }
  func.func @transform_12(%arg0: i32, %arg1: i32) -> (i32, i32) {
    %c0_i32 = arith.constant 0 : i32
    %c0_i32_0 = arith.constant 0 : i32
    %c0_i32_1 = arith.constant 0 : i32
    return %c0_i32, %c0_i32_0 : i32, i32
  }
  func.func @transform_13(%arg0: i32, %arg1: i32) -> (i32, i32) {
    %c0_i32 = arith.constant 0 : i32
    %c0_i32_0 = arith.constant 0 : i32
    %c0_i32_1 = arith.constant 0 : i32
    return %c0_i32, %c0_i32_0 : i32, i32
  }
  func.func @transform_14(%arg0: i32, %arg1: i32) -> (i32, i32) {
    %c0_i32 = arith.constant 0 : i32
    %c0_i32_0 = arith.constant 0 : i32
    %c0_i32_1 = arith.constant 0 : i32
    return %c0_i32, %c0_i32_0 : i32, i32
  }
  func.func @transform_15(%arg0: i32, %arg1: i32) -> (i32, i32) {
    %c0_i32 = arith.constant 0 : i32
    %c0_i32_0 = arith.constant 0 : i32
    %c0_i32_1 = arith.constant 0 : i32
    return %c0_i32, %c0_i32_0 : i32, i32
  }
  func.func @transform_16(%arg0: i32, %arg1: i32) -> (i32, i32, i32) {
    %c0_i32 = arith.constant 0 : i32
    %c0_i32_0 = arith.constant 0 : i32
    return %arg0, %arg1, %c0_i32 : i32, i32, i32
  }
}

</mosaic_0001>

<bundles_post_ra>
// kernel: tpu_custom_call.1
= control target key start
LH: loop header
LB: loop body
LE: loop exit
PB: predicated region body
PF: predicated region fallthrough
CT: control target
= control target key end

     0   :  { %s2007_s0 = inlined_call_operand.vmem [shape: f32[2,8,32], index: 0, kind: input, shape index: {}]   ;;  %s2008_s1 = inlined_call_operand.vmem [shape: f32[2,8,32], index: 1, kind: input, shape index: {}]   ;;  %s2009_s2 = inlined_call_operand.vmem [shape: bf16[32,32], index: 2, kind: input, shape index: {}]   ;;  %s2010_s3 = inlined_call_operand.vmem [shape: f32[1,32], index: 3, kind: input, shape index: {}]   ;;  %s2011_s4 = inlined_call_operand.hbm [shape: bf16[32,64], index: 4, kind: input, shape index: {}]   ;;  %s2012_s5 = inlined_call_operand.vmem [shape: f32[1,64], index: 5, kind: input, shape index: {}]   ;;  %s2013_s6 = inlined_call_operand.hbm [shape: bf16[32,32], index: 6, kind: input, shape index: {}]   ;;  %s2014_s7 = inlined_call_operand.vmem [shape: f32[1,32], index: 7, kind: input, shape index: {}]   ;;  %s2015_s8 = inlined_call_operand.vmem [shape: f32[1,32], index: 8, kind: input, shape index: {}]   ;;  %s2016_s9 = inlined_call_operand.vmem [shape: f32[1,32], index: 9, kind: input, shape index: {}]   ;;  %s2017_s10 = inlined_call_operand.hbm [shape: bf16[32,64], index: 10, kind: input, shape index: {}]   ;;  %s2018_s11 = inlined_call_operand.vmem [shape: f32[1,64], index: 11, kind: input, shape index: {}]   ;;  %s2019_s12 = inlined_call_operand.vmem [shape: bf16[64,32], index: 12, kind: input, shape index: {}]   ;;  %s2020_s13 = inlined_call_operand.vmem [shape: f32[1,32], index: 13, kind: input, shape index: {}]   ;;  %s2021_s14 = inlined_call_operand.vmem [shape: f32[1,32], index: 14, kind: input, shape index: {}]   ;;  %s2022_s15 = inlined_call_operand.vmem [shape: f32[1,32], index: 15, kind: input, shape index: {}]   ;;  %s2023_s16 = inlined_call_operand.hbm [shape: f32[2,8,32], index: 16, kind: output, shape index: {}]  }
   0x1   :  { %2034 = sst [smem:[#allocation20_spill]] %s2007_s0 }
   0x2   :  { %2035 = sst [smem:[#allocation21_spill]] %s2013_s6 }
   0x3   :  { %2036 = sst [smem:[#allocation22_spill]] %s2021_s14 }
   0x4   :  { %2037 = sst [smem:[#allocation23_spill]] %s2022_s15 }
   0x5   :  { %2038 = sst [smem:[#allocation24_spill]] %s2023_s16 }
   0x6   :  { %21 = vsyncpa [#allocation3], 0 }
   0x7   :  { %22 = vsyncpa [#allocation6], 0 }
   0x8   :  { %23 = vsyncpa [#allocation4], 0 }
   0x9   :  { %25 = vsyncpa [#allocation4 + $0x1], 0  ;;  %s1775_s21 = smov 0   ;;  %s1777_s22 = smov 0  }
   0xa   :  { %s1779_s23 = smov 0   ;;  %s1781_s24 = smov 0  }
   0xb   :  { %s1783_s25 = smov 0   ;;  %s1785_s26 = smov 0  }
   0xc LB: > { %2039 = sst [smem:[#allocation12_spill]] %s1655_s21  ;;  %s1281_s27 = sadd.s32 4294967295, %s1675_s26   ;;  %s1675_s26 = sphi %s1785_s26, %s31_s26   ;;  %s1671_s25 = sphi %s1783_s25, %s2065_s25   ;;  %s1667_s24 = sphi %s1781_s24, %s2064_s24   ;;  %s1663_s23 = sphi %s1779_s23, %s2063_s23   ;;  %s1659_s22 = sphi %s1777_s22, %s2067_s22   ;;  %s1655_s21 = sphi %s1775_s21, %s2066_s21  }
   0xd   : > { %2040 = sst [smem:[#allocation13_spill]] %s1663_s23  ;;  %s1282_s28 = sadd.s32 4294967294, %s1675_s26  }
   0xe   : > { %2041 = sst [smem:[#allocation14_spill]] %s1671_s25  ;;  %s43_s29 = sadd.s32 1, %s1671_s25 }
   0xf   : > { %2042 = sst [smem:[#allocation15_spill]] %s1675_s26  ;;  %s400_s30 = sadd.s32 1, %s1663_s23 }
  0x10   : > { %p45_p0 = scmp.ge.s32.totalorder %s43_s29, 2  ;;  %p410_p1 = scmp.ne.s32.totalorder %s1663_s23, %s1659_s22 }
  0x11   : > { %p411_p2 = scmp.eq.s32.totalorder %s1281_s27, 1  ;;  %p416_p3 = scmp.ne.s32.totalorder %s1659_s22, %s1655_s21 }
  0x12   : > { %s2069_s29 = smov (%p45_p0, %s43_s29), 0  ;;  %p417_p5 = scmp.eq.s32.totalorder %s1282_s28, 1 }
  0x13   : > { %2043 = sst [smem:[#allocation16_spill]] %s2069_s29  ;;  %p1815_p4 = por %p411_p2, %p410_p1 }
  0x14   : > { %s395_s17 = ssub.s32 %s1671_s25, %s2069_s29  ;;  %p1283_p6 = scmp.ge.s32.totalorder %s1675_s26, 1 }
  0x15   : > { %s2044_s0 = scalar_select %p1815_p4, 1, 0 }
  0x16   : > { %p398_p7 = scmp.eq.s32.totalorder %s395_s17, 0  ;;  %p1822_p8 = por %p417_p5, %p416_p3 }
  0x17   : > { %2045 = sst [smem:[#allocation17_spill]] %s2044_s0  ;;  %p424_p9 = scmp.lt.s32.totalorder %s1675_s26, 3 }
  0x18   : > { %s2046_s18 = scalar_select %p1822_p8, 1, 0 }
  0x19   : > { %s1828_s19 = scalar_select %p398_p7, %s1663_s23, %s400_s30  }
  0x1a   : > { %2047 = sst [smem:[#allocation18_spill]] %s2046_s18  ;;  %p1830_p10 = pnand %p1283_p6, %p424_p9 }
  0x1b   : > { %2048 = sst [smem:[#allocation19_spill]] %s1828_s19  ;;  %p1834_p11 = scmp.eq.s32.totalorder %s1281_s27, 0 }
  0x1c   : > { %p1386_p12 = pneg %p1830_p10  ;;  %s2051_s6 = sld [smem:[#allocation21_spill]] }
  0x1d   : > { %s1677_s25 = smov [#allocation5]   ;;  %s1678_s19 = smov 64  }
  0x1e   : > { %p1845_p13 = pnand %p1834_p11, %p1386_p12  ;;  %s460_s27 = sshll.u32 %s1677_s25, 4  ;;  %s461_s27 = int_to_ptr.vmem [resolvable:$true] %s460_s27 }
  0x1f   : > { %s1679_s23 = smov 4   ;;  %s441_s28 = sshll.u32 %s2011_s4, 4  ;;  %s442_s28 = int_to_ptr.hbm [resolvable:$true] %s441_s28 }
  0x20   : > { %s1680_s17 = smov [#allocation2]   ;;  %s481_s16 = sshll.u32 %s2017_s10, 4  ;;  %s482_s16 = int_to_ptr.hbm [resolvable:$true] %s481_s16 }
  0x21   : > { %s1681_s25 = smov [#allocation7]  }
  0x22   : > { %s458_s29 = sshll.u32 %s2051_s6, 4  ;;  %s443_s6 = sshll.u32 %s1680_s17, 4  ;;  %s459_s29 = int_to_ptr.hbm [resolvable:$true] %s458_s29  ;;  %s444_s6 = int_to_ptr.vmem [resolvable:$true] %s443_s6 }
  0x23   : > { %1392 = dma.hbm_to_vmem [thread:$0]  (!%p1845_p13), %s459_s29, 256, %s461_s27, [#allocation6], %s1678_s19, %s1678_s19, %s1679_s23  }
  0x24   : > { %1389 = dma.hbm_to_vmem [thread:$0]  (!%p1845_p13), %s442_s28, 256, %s444_s6, [#allocation3], %s1678_s19, %s1678_s19, %s1679_s23  }
  0x25   : > { %s483_s14 = sshll.u32 %s1681_s25, 4  ;;  %531 = sbr.rel (%p1830_p10) target bundleno = 1900 (0x76c), region = 84  ;;  %s484_s14 = int_to_ptr.vmem [resolvable:$true] %s483_s14 }
  0x26   : > { %1395 = dma.hbm_to_vmem [thread:$0]  (!%p1845_p13), %s482_s16, 256, %s484_s14, [#allocation6], %s1678_s19, %s1678_s19, %s1679_s23  }
  0x2a   : > { %1642 = dma.done.wait (%p1834_p11), [#allocation3], 256  }
  0x2b   : > { %1644 = vsyncadd (%p1834_p11), [#allocation3], 4294967040 }
  0x2c   : > { %1646 = dma.done.wait (%p1834_p11), [#allocation6], 512  }
  0x2d   : > { %1648 = vsyncadd (%p1834_p11), [#allocation6], 4294966784  ;;  %p598_p0 = scmp.lt.s32.totalorder %s1667_s24, 1  ;;  %s2053_s0 = sld [smem:[#allocation20_spill]]  ;;  %v1363_v0 = vld [vmem:[#allocation2 + $0x8] sm:$0xff]  ;;  %v1362_v1 = vld [vmem:[#allocation2] sm:$0xff] }
  0x2e   : > { %v1361_v3 = vld [vmem:[%s2009_s2 + $0x8] sm:$0xff]  ;;  %v1360_v4 = vld [vmem:[%s2009_s2] sm:$0xff]  ;;  %681 = vmatpush.bf16.msra.mxu1 %v1363_v0  ;;  %vm634_vm0 = vcmask 261120   ;;  %vm703_vm1 = vcmask 64512   ;;  %s1684_s15 = smov 104   ;;  %s1685_s16 = smov 96  }
  0x2f   : > { %s599_s6 = scalar_select %p598_p0, %s1667_s24, 1  ;;  %644 = vmatpush.bf16.msra.mxu0 %v1361_v3  ;;  %v1468_v8 = vld [vmem:[%s2012_s5] ss:$0 sm:$0xff]  ;;  %vm835_vm2 = vcmask 1043456   ;;  %vm943_vm3 = vcmask 130048   ;;  %vm946_vm4 = vcmask 195584  }
  0x30   : > { %v1469_v9 = vld [vmem:[%s2010_s3] ss:$0 sm:$0xff]  ;;  %s1687_s26 = smov 8   ;;  %s1688_s29 = smov 24   ;;  %vm1099_vm9 = vcmask 523264  }
  0x31   : > { %s1293_s14 = sshll.u32 %s599_s6, 3  ;;  %s1682_s6 = smov 112  }
  0x32   : > { %s608_s23 = scalar_lea.vmem %s2008_s1, %s1293_s14  ;;  %682 = vmatpush.bf16.msra.mxu1 %v1362_v1  ;;  %s1357_s20 = sshll.u32 %s1667_s24, 3 }
  0x33   : > { %s604_s18 = scalar_lea.vmem %s2053_s0, %s1293_s14  ;;  %v612_v2 = vld [vmem:[%s608_s23] sm:$0xff]  ;;  %645 = vmatpush.bf16.msra.mxu0 %v1360_v4  ;;  %s1683_s14 = smov 120  }
  0x34   : > { %v1885_v5 = vld [vmem:[%s604_s18] sm:$0xff]  ;;  %v613_v6 = vpack.c.bf16 %v612_v2, %v612_v2  ;;  %s1686_s23 = smov 16   ;;  %s595_s18 = sand.u32 1, %s1659_s22  }
  0x35   : > { %v611_v7 = vpack.c.bf16 %v1885_v5, %v1885_v5  ;;  %s1292_s19 = sshll.u32 %s595_s18, 3  ;;  %s2054_s27 = sld [smem:[#allocation22_spill]] }
  0x36   : > { %1312 = vmatmul.msk.bf16.vlgmr.msra.gmra.mxu1 %vm634_vm0, %v613_v6  ;;  %s2055_s25 = sld [smem:[#allocation24_spill]]  ;;  %s1151_s21 = scalar_lea.sflag [#allocation4], %s595_s18 }
  0x37   : > { %1303 = vmatmul.msk.bf16.vlgmr.msra.gmra.mxu0 %vm634_vm0, %v611_v7 }
  0xb3   : > { %v684_v10 = vpop.f32.mrf.mxu1 }
  0xb4   : > { %v685_v11 = vadd.f32 %v1468_v8, %v684_v10  ;;  %v647_v12 = vpop.f32.mrf.mxu0 }
  0xb5   : > { %v648_v13 = vadd.f32 %v1469_v9, %v647_v12 }
  0xb6   : > { %v1897_v14 = vpack.c.bf16 %v685_v11, %v685_v11 }
  0xb7   : > { %v651_v15 = vpack.c.bf16 %v648_v13, %v648_v13 }
  0xb8   : > { %699 = vrot.lane.b32.xlu1 %v1897_v14, %s1682_s6  ;;  %697 = vrot.lane.b32.xlu0 %v1897_v14, %s1683_s14  ;;  %v708_v16 = vsel %vm703_vm1, %v1897_v14, 0  ;;  %v828_v60 = vunpack.c.l.b16 %v1897_v14 }
  0xb9   : > { %717 = vmatpush.bf16.xpose.msra.mxu2 %v708_v16  ;;  %692 = vrot.lane.b32.xlu2 %v651_v15, %s1682_s6  ;;  %s2056_s6 = smov %s2055_s25 }
  0xba   : > { %v829_v62 = vpack.c.b16 %v828_v60, %v828_v60 }
  0xbb   : > { %v686_v17 = vpop.f32.mrf.mxu1 }
  0xbc   : > { %v649_v18 = vpop.f32.mrf.mxu0 }
  0xc0   : > { %701 = vrot.lane.b32.xlu1 %v1897_v14, %s1684_s15  ;;  %690 = vrot.lane.b32.xlu0 %v651_v15, %s1683_s14  ;;  %s1162_s14 = scalar_lea.hbm %s2055_s25, %s1357_s20 }
  0xc1   : > { %1313 = vmatmul.msk.bf16.vlgmr.msra.gmra.mxu2 %vm703_vm1, %v651_v15  ;;  %694 = vrot.lane.b32.xlu2 %v651_v15, %s1684_s15  ;;  %s1166_s0 = sshll.u32 %s1162_s14, 4  ;;  %s1167_s0 = int_to_ptr.hbm [resolvable:$true] %s1166_s0 }
  0xc2   : > { %s1603_s30 = sshra.s32 %s1167_s0, 4  ;;  %s1604_s30 = int_to_ptr.hbm [resolvable:$true] %s1603_s30 }
  0xc3   : > { %s1605_s20 = scalar_lea.hbm %s1604_s30, 8  ;;  %p1610_p5 = scmp.lt.s32.totalorder %s1604_s30, %s2056_s6 }
  0xc4   : > { %p1606_p1 = scmp.ne.s32.totalorder %s1604_s30, %s1605_s20 }
  0xc6   : > { %p1607_p2 = pnand %p1606_p1, %p1815_p4 }
  0xc8   : > { %p1608_p3 = pneg %p1607_p2 }
 0x113   : > { %v693_v23 = vpop.permute.xlu2 %692 }
 0x11b   : > { %v695_v27 = vpop.permute.xlu2 %694 }
 0x12a   : > { %v700_v19 = vpop.permute.xlu1 %699  ;;  %v698_v20 = vpop.permute.xlu0 %697 }
 0x12b   : > { %v727_v21 = vsel %vm703_vm1, %v698_v20, 0  ;;  %v746_v22 = vsel %vm703_vm1, %v700_v19, 0  ;;  %v875_v55 = vunpack.c.l.b16 %v700_v19  ;;  %v852_v56 = vunpack.c.l.b16 %v698_v20 }
 0x12c   : > { %736 = vmatpush.bf16.xpose.msra.mxu3 %v727_v21  ;;  %755 = vmatpush.bf16.xpose.msrb.mxu0 %v746_v22 }
 0x12d   : > { %v876_v57 = vpack.c.b16 %v875_v55, %v875_v55  ;;  %v853_v58 = vpack.c.b16 %v852_v56, %v852_v56  ;;  %v1470_v55 = vld [vmem:[%s2014_s7] ss:$0 sm:$0xff] }
 0x132   : > { %v702_v24 = vpop.permute.xlu1 %701  ;;  %v691_v25 = vpop.permute.xlu0 %690 }
 0x133   : > { %1314 = vmatmul.msk.bf16.vlgmr.msra.gmra.mxu3 %vm703_vm1, %v691_v25  ;;  %1315 = vmatmul.msk.bf16.vlgmr.msrb.gmra.mxu0 %vm703_vm1, %v693_v23  ;;  %v765_v26 = vsel %vm703_vm1, %v702_v24, 0  ;;  %v898_v59 = vunpack.c.l.b16 %v702_v24 }
 0x134   : > { %774 = vmatpush.bf16.xpose.msrb.mxu1 %v765_v26 }
 0x135   : > { %v899_v61 = vpack.c.b16 %v898_v59, %v898_v59 }
 0x13b   : > { %1316 = vmatmul.msk.bf16.vlgmr.msrb.gmra.mxu1 %vm703_vm1, %v695_v27 }
 0x144   : > { %v719_v28 = vpop.f32.mrf.mxu2 }
 0x145   : > { %v780_v39 = vsel %vm703_vm1, %v719_v28, -inf }
 0x14c   : > { %v721_v29 = vpop.f32.mrf.mxu2 }
 0x1b0   : > { %v757_v30 = vpop.f32.mrf.mxu0 }
 0x1b1   : > { %v786_v31 = vsel %vm703_vm1, %v757_v30, -inf }
 0x1b2   : > { %787 = vmax.xlane.f32.xlu1 %v786_v31 }
 0x1b6   : > { %v738_v32 = vpop.f32.mrf.mxu3 }
 0x1b7   : > { %v783_v33 = vsel %vm703_vm1, %v738_v32, -inf }
 0x1b8   : > { %v759_v34 = vpop.f32.mrf.mxu0  ;;  %v776_v35 = vpop.f32.mrf.mxu1  ;;  %784 = vmax.xlane.f32.xlu0 %v783_v33 }
 0x1b9   : > { %v789_v36 = vsel %vm703_vm1, %v776_v35, -inf }
 0x1ba   : > { %790 = vmax.xlane.f32.xlu2 %v789_v36 }
 0x1be   : > { %v740_v37 = vpop.f32.mrf.mxu3 }
 0x1c0   : > { %v778_v38 = vpop.f32.mrf.mxu1 }
 0x1c2   : > { %781 = vmax.xlane.f32.xlu2 %v780_v39 }
 0x225   : > { %v788_v40 = vpop.xlane.xlu1 %787 }
 0x226   : > { %v794_v41 = vsub.f32 %v757_v30, %v788_v40 }
 0x228   : > { %v800_v42 = vmul.f32 1.442695, %v794_v41 }
 0x22a   : > { %1477 = vpow2.f32 %v800_v42 }
 0x22b   : > { %v785_v43 = vpop.xlane.xlu0 %784 }
 0x22c   : > { %v793_v44 = vsub.f32 %v738_v32, %v785_v43 }
 0x22d   : > { %v791_v45 = vpop.xlane.xlu2 %790 }
 0x22e   : > { %v798_v46 = vmul.f32 1.442695, %v793_v44  ;;  %v795_v47 = vsub.f32 %v776_v35, %v791_v45 }
 0x230   : > { %v1478_v48 = vpop.eup %1477  ;;  %1479 = vpow2.f32 %v798_v46  ;;  %v802_v49 = vmul.f32 1.442695, %v795_v47  ;;  %v1365_v46 = vld [vmem:[#allocation5 + $0x8] sm:$0xff]  ;;  %v1364_v47 = vld [vmem:[#allocation5] sm:$0xff] }
 0x231   : > { %v810_v50 = vsel %vm703_vm1, %v1478_v48, 0.0 }
 0x232   : > { %1481 = vpow2.f32 %v802_v49  ;;  %811 = vadd.xlane.f32.xlu1 %v810_v50 }
 0x235   : > { %v782_v63 = vpop.xlane.xlu2 %781 }
 0x236   : > { %v1480_v51 = vpop.eup %1479  ;;  %v792_v0 = vsub.f32 %v719_v28, %v782_v63 }
 0x237   : > { %v807_v52 = vsel %vm703_vm1, %v1480_v51, 0.0 }
 0x238   : > { %v1482_v53 = vpop.eup %1481  ;;  %808 = vadd.xlane.f32.xlu0 %v807_v52  ;;  %v796_v1 = vmul.f32 1.442695, %v792_v0 }
 0x239   : > { %v813_v54 = vsel %vm703_vm1, %v1482_v53, 0.0 }
 0x23a   : > { %814 = vadd.xlane.f32.xlu2 %v813_v54  ;;  %1483 = vpow2.f32 %v796_v1 }
 0x240   : > { %v1484_v2 = vpop.eup %1483 }
 0x241   : > { %v804_v3 = vsel %vm703_vm1, %v1484_v2, 0.0 }
 0x24b   : > { %877 = vrot.lane.b32.xlu1 %v876_v57, %s1685_s16 }
 0x24c   : > { %854 = vrot.lane.b32.xlu0 %v853_v58, %s1685_s16 }
 0x252   : > { %900 = vrot.lane.b32.xlu2 %v899_v61, %s1685_s16  ;;  %v1689_v61 = vmov 32.0  }
 0x253   : > { %830 = vrot.lane.b32.xlu1 %v829_v62, %s1685_s16 }
 0x276   : > { %805 = vadd.xlane.f32.xlu0 %v804_v3 }
 0x2a5   : > { %v812_v6 = vpop.xlane.xlu1 %811 }
 0x2ab   : > { %v809_v7 = vpop.xlane.xlu0 %808 }
 0x2ad   : > { %v815_v4 = vpop.xlane.xlu2 %814 }
 0x2ae   : > { %1485 = vrcp.f32 %v815_v4 }
 0x2af   : > { %1487 = vrcp.f32 %v812_v6 }
 0x2b0   : > { %1489 = vrcp.f32 %v809_v7 }
 0x2b4   : > { %v1486_v8 = vpop.eup %1485 }
 0x2b5   : > { %v823_v9 = vmul.f32 %v1486_v8, %v1482_v53  ;;  %v901_v10 = vpop.permute.xlu2 %900  ;;  %v1488_v13 = vpop.eup %1487 }
 0x2b6   : > { %v906_v11 = vsel %vm835_vm2, %v901_v10, 0  ;;  %v1490_v14 = vpop.eup %1489  ;;  %v822_v15 = vmul.f32 %v1488_v13, %v1478_v48  ;;  %v1366_v10 = vld [vmem:[#allocation7] sm:$0xff] }
 0x2b7   : > { %v827_v12 = vpack.c.bf16 %v823_v9, %v823_v9  ;;  %915 = vmatpush.bf16.msra.mxu1 %v906_v11  ;;  %v821_v16 = vmul.f32 %v1490_v14, %v1480_v51  ;;  %v1371_v11 = vld [vmem:[%s2019_s12 + $0x18] sm:$0xff]  ;;  %v1370_v14 = vld [vmem:[%s2019_s12 + $0x10] sm:$0xff] }
 0x2b8   : > { %v826_v21 = vpack.c.bf16 %v822_v15, %v822_v15 }
 0x2b9   : > { %v825_v22 = vpack.c.bf16 %v821_v16, %v821_v16 }
 0x2ba   : > { %1320 = vmatmul.msk.bf16.vlgmr.msra.gmra.mxu1 %vm703_vm1, %v827_v12 }
 0x2bd   : > { %v878_v17 = vpop.permute.xlu1 %877 }
 0x2be   : > { %v883_v18 = vsel %vm835_vm2, %v878_v17, 0  ;;  %v855_v19 = vpop.permute.xlu0 %854 }
 0x2bf   : > { %892 = vmatpush.bf16.msra.mxu0 %v883_v18  ;;  %v860_v20 = vsel %vm835_vm2, %v855_v19, 0 }
 0x2c0   : > { %869 = vmatpush.bf16.msrb.mxu3 %v860_v20 }
 0x2c2   : > { %1319 = vmatmul.msk.bf16.vlgmr.msra.gmra.mxu0 %vm703_vm1, %v826_v21 }
 0x2c3   : > { %1318 = vmatmul.msk.bf16.vlgmr.msrb.gmra.mxu3 %vm703_vm1, %v825_v22  ;;  %1107 = vmatpush.bf16.msrb.mxu0 %v1371_v11  ;;  %v1471_v22 = vld [vmem:[%s2015_s8] ss:$0 sm:$0xff] }
 0x2c5   : > { %v831_v23 = vpop.permute.xlu1 %830 }
 0x2c6   : > { %v837_v24 = vsel %vm835_vm2, %v831_v23, 0 }
 0x2c7   : > { %846 = vmatpush.bf16.msrb.mxu2 %v837_v24  ;;  %1108 = vmatpush.bf16.msrb.mxu0 %v1370_v14  ;;  %v1472_v24 = vld [vmem:[%s2016_s9] ss:$0 sm:$0xff] }
 0x2cb   : > { %977 = vmatpush.bf16.msra.mxu2 %v1365_v46 }
 0x2cf   : > { %978 = vmatpush.bf16.msra.mxu2 %v1364_v47 }
 0x2e9   : > { %v806_v25 = vpop.xlane.xlu0 %805 }
 0x2ea   : > { %1491 = vrcp.f32 %v806_v25 }
 0x2eb   : > { %1493 = vrcp.f32 %v1689_v61 }
 0x2f0   : > { %v1492_v26 = vpop.eup %1491 }
 0x2f1   : > { %v820_v27 = vmul.f32 %v1492_v26, %v1484_v2  ;;  %v1494_v62 = vpop.eup %1493 }
 0x2f2   : > { %v989_v63 = vmul.f32 32.0, %v1494_v62  ;;  %vm993_vm5 = vweird.f32 %v1494_v62 }
 0x2f3   : > { %v824_v28 = vpack.c.bf16 %v820_v27, %v820_v27 }
 0x2f4   : > { %v990_v0 = vsub.f32 1.0, %v989_v63 }
 0x2f5   : > { %1317 = vmatmul.msk.bf16.vlgmr.msrb.gmra.mxu2 %vm703_vm1, %v824_v28 }
 0x2f6   : > { %v991_v1 = vmul.f32 %v1494_v62, %v990_v0 }
 0x2f8   : > { %v992_v2 = vadd.f32 %v1494_v62, %v991_v1 }
 0x2fa   : > { %v994_v3 = vsel %vm993_vm5, %v1494_v62, %v992_v2 }
 0x337   : > { %v917_v29 = vpop.f32.mrf.mxu1 }
 0x338   : > { %v924_v39 = vpack.c.bf16 %v917_v29, %v917_v29  ;;  %v1369_v29 = vld [vmem:[%s2019_s12 + $0x8] sm:$0xff] }
 0x339   : > { %1109 = vmatpush.bf16.msrb.mxu0 %v1369_v29 }
 0x33a   : > { %v936_v42 = vunpack.c.l.b16 %v924_v39 }
 0x33c   : > { %v937_v43 = vpack.c.b16 %v936_v42, %v936_v42 }
 0x33f   : > { %v894_v30 = vpop.f32.mrf.mxu0  ;;  %v919_v31 = vpop.f32.mrf.mxu1 }
 0x340   : > { %v923_v32 = vpack.c.bf16 %v894_v30, %v894_v30  ;;  %v1368_v30 = vld [vmem:[%s2019_s12] sm:$0xff] }
 0x341   : > { %1110 = vmatpush.bf16.msrb.mxu0 %v1368_v30  ;;  %v1473_v31 = vld [vmem:[%s2018_s11] ss:$0 sm:$0xff] }
 0x342   : > { %v931_v33 = vunpack.c.l.b16 %v923_v32 }
 0x344   : > { %v932_v34 = vpack.c.b16 %v931_v33, %v931_v33 }
 0x346   : > { %933 = vrot.lane.b32.xlu1 %v932_v34, %s1686_s23  ;;  %v871_v35 = vpop.f32.mrf.mxu3 }
 0x347   : > { %v922_v36 = vpack.c.bf16 %v871_v35, %v871_v35  ;;  %v896_v37 = vpop.f32.mrf.mxu0 }
 0x348   : > { %v1474_v37 = vld [vmem:[%s2020_s13] ss:$0 sm:$0xff] }
 0x349   : > { %v926_v38 = vunpack.c.l.b16 %v922_v36 }
 0x34b   : > { %v927_v40 = vpack.c.b16 %v926_v38, %v926_v38 }
 0x34d   : > { %928 = vrot.lane.b32.xlu2 %v927_v40, %s1687_s26  ;;  %s2058_s26 = sld [smem:[#allocation23_spill]] }
 0x34e   : > { %v873_v41 = vpop.f32.mrf.mxu3 }
 0x355   : > { %938 = vrot.lane.b32.xlu2 %v937_v43, %s1688_s29  ;;  %s597_s29 = scalar_lea.vmem [#allocation8], %s1292_s19  ;;  %s1609_s19 = scalar_lea.hbm %s2056_s6, 16 }
 0x356   : > { %s1164_s24 = sshll.u32 %s597_s29, 4  ;;  %p1611_p6 = scmp.lt.s32.totalorder %s1609_s19, %s1605_s20  ;;  %s1165_s24 = int_to_ptr.vmem [resolvable:$true] %s1164_s24 }
 0x358   : > { %p1612_p7 = por %p1611_p6, %p1610_p5 }
 0x35a   : > { %p1613_p9 = pnand %p1612_p7, %p1608_p3 }
 0x378   : > { %v848_v44 = vpop.f32.mrf.mxu2 }
 0x379   : > { %v921_v49 = vpack.c.bf16 %v848_v44, %v848_v44 }
 0x380   : > { %v850_v45 = vpop.f32.mrf.mxu2 }
 0x3a7   : > { %v929_v48 = vpop.permute.xlu2 %928 }
 0x3a8   : > { %v942_v50 = vsel %vm703_vm1, %v921_v49, %v929_v48 }
 0x3af   : > { %v939_v52 = vpop.permute.xlu2 %938 }
 0x3b8   : > { %v934_v51 = vpop.permute.xlu1 %933 }
 0x3b9   : > { %v945_v53 = vsel %vm943_vm3, %v942_v50, %v934_v51 }
 0x3ba   : > { %v948_v54 = vsel %vm946_vm4, %v945_v53, %v939_v52 }
 0x3bb   : > { %1329 = vmatmul.msk.bf16.vlgmr.msra.gmra.mxu2 %vm634_vm0, %v948_v54 }
 0x43e   : > { %v980_v56 = vpop.f32.mrf.mxu2 }
 0x43f   : > { %v981_v57 = vadd.f32 %v1470_v55, %v980_v56 }
 0x441   : > { %v984_v58 = vadd.f32 %v981_v57, %v1885_v5  ;;  %v1367_v5 = vld [vmem:[#allocation7 + $0x8] sm:$0xff]  ;;  %v1475_v57 = vld [vmem:[%s2054_s27] ss:$0 sm:$0xff] }
 0x442   : > { %1054 = vmatpush.bf16.msra.mxu3 %v1367_v5 }
 0x443   : > { %v985_v59 = vsel %vm634_vm0, %v984_v58, 0.0 }
 0x444   : > { %986 = vadd.xlane.f32.xlu1 %v985_v59 }
 0x446   : > { %v982_v60 = vpop.f32.mrf.mxu2  ;;  %1055 = vmatpush.bf16.msra.mxu3 %v1366_v10 }
 0x447   : > { %v1476_v60 = vld [vmem:[%s2058_s26] ss:$0 sm:$0xff] }
 0x4b7   : > { %v987_v4 = vpop.xlane.xlu1 %986 }
 0x4b8   : > { %v995_v6 = vmul.f32 %v994_v3, %v987_v4 }
 0x4ba   : > { %v996_v7 = vsub.f32 %v984_v58, %v995_v6 }
 0x4bc   : > { %v997_v8 = vmul.f32 %v996_v7, %v996_v7 }
 0x4be   : > { %v998_v9 = vsel %vm634_vm0, %v997_v8, 0.0 }
 0x4bf   : > { %999 = vadd.xlane.f32.xlu2 %v998_v9 }
 0x532   : > { %v1000_v12 = vpop.xlane.xlu2 %999 }
 0x533   : > { %v1001_v13 = vmul.f32 %v1000_v12, %v994_v3 }
 0x535   : > { %v1002_v15 = vadd.f32 1e-05, %v1001_v13 }
 0x537   : > { %1495 = vrsqrt.f32 %v1002_v15  ;;  %vm1009_vm7 = vweird.f32 %v1002_v15 }
 0x53d   : > { %v1496_v16 = vpop.eup %1495 }
 0x53e   : > { %v1004_v17 = vmul.f32 %v1496_v16, %v1002_v15  ;;  %vm1010_vm6 = vweird.f32 %v1496_v16 }
 0x53f   : > { %vm1011_vm8 = vmor %vm1009_vm7, %vm1010_vm6 }
 0x540   : > { %v1005_v18 = vmul.f32 %v1496_v16, %v1004_v17 }
 0x542   : > { %v1006_v19 = vmul.f32 0.5, %v1005_v18 }
 0x544   : > { %v1007_v20 = vsub.f32 1.5, %v1006_v19 }
 0x546   : > { %v1008_v21 = vmul.f32 %v1496_v16, %v1007_v20 }
 0x548   : > { %v1012_v23 = vsel %vm1011_vm8, %v1496_v16, %v1008_v21 }
 0x549   : > { %v1013_v25 = vmul.f32 %v1012_v23, %v996_v7 }
 0x54b   : > { %v1018_v26 = vmul.f32 %v1471_v22, %v1013_v25 }
 0x54d   : > { %v1023_v27 = vadd.f32 %v1472_v24, %v1018_v26 }
 0x54f   : > { %v1024_v28 = vpack.c.bf16 %v1023_v27, %v1023_v27 }
 0x551   : > { %1338 = vmatmul.msk.bf16.vlgmr.msra.gmra.mxu3 %vm634_vm0, %v1024_v28 }
 0x5d4   : > { %v1057_v32 = vpop.f32.mrf.mxu3 }
 0x5d5   : > { %v1058_v33 = vadd.f32 %v1473_v31, %v1057_v32 }
 0x5d7   : > { %v1061_v34 = vmax.f32 %v1058_v33, 0.0 }
 0x5d9   : > { %v1062_v35 = vpack.c.bf16 %v1061_v34, %v1061_v34 }
 0x5db   : > { %1355 = vmatmul.msk.bf16.vlgmr.msrb.gmra.mxu0 %vm1099_vm9, %v1062_v35 }
 0x5dc   : > { %v1059_v36 = vpop.f32.mrf.mxu3 }
 0x658   : > { %v1112_v38 = vpop.f32.mrf.mxu0 }
 0x659   : > { %v1113_v39 = vadd.f32 %v1474_v37, %v1112_v38 }
 0x65b   : > { %v1116_v40 = vadd.f32 %v1113_v39, %v1023_v27 }
 0x65d   : > { %v1117_v41 = vsel %vm634_vm0, %v1116_v40, 0.0 }
 0x65e   : > { %1118 = vadd.xlane.f32.xlu0 %v1117_v41 }
 0x660   : > { %v1114_v42 = vpop.f32.mrf.mxu0 }
 0x6d1   : > { %v1119_v43 = vpop.xlane.xlu0 %1118 }
 0x6d2   : > { %v1120_v44 = vmul.f32 %v1119_v43, %v994_v3 }
 0x6d4   : > { %v1121_v45 = vsub.f32 %v1116_v40, %v1120_v44 }
 0x6d6   : > { %v1122_v46 = vmul.f32 %v1121_v45, %v1121_v45 }
 0x6d8   : > { %v1123_v47 = vsel %vm634_vm0, %v1122_v46, 0.0 }
 0x6d9   : > { %1124 = vadd.xlane.f32.xlu0 %v1123_v47 }
 0x74c   : > { %v1125_v48 = vpop.xlane.xlu0 %1124 }
 0x74d   : > { %v1126_v49 = vmul.f32 %v1125_v48, %v994_v3 }
 0x74f   : > { %v1127_v50 = vadd.f32 1e-05, %v1126_v49 }
 0x751   : > { %1497 = vrsqrt.f32 %v1127_v50  ;;  %vm1134_vm11 = vweird.f32 %v1127_v50 }
 0x757   : > { %v1498_v51 = vpop.eup %1497 }
 0x758   : > { %v1129_v52 = vmul.f32 %v1498_v51, %v1127_v50  ;;  %vm1135_vm10 = vweird.f32 %v1498_v51 }
 0x759   : > { %vm1136_vm12 = vmor %vm1134_vm11, %vm1135_vm10 }
 0x75a   : > { %v1130_v53 = vmul.f32 %v1498_v51, %v1129_v52 }
 0x75c   : > { %v1131_v54 = vmul.f32 0.5, %v1130_v53 }
 0x75e   : > { %v1132_v55 = vsub.f32 1.5, %v1131_v54 }
 0x760   : > { %v1133_v56 = vmul.f32 %v1498_v51, %v1132_v55 }
 0x762   : > { %v1137_v58 = vsel %vm1136_vm12, %v1498_v51, %v1133_v56 }
 0x763   : > { %v1138_v59 = vmul.f32 %v1137_v58, %v1121_v45 }
 0x765   : > { %v1143_v61 = vmul.f32 %v1475_v57, %v1138_v59 }
 0x767   : > { %v1148_v62 = vadd.f32 %v1476_v60, %v1143_v61 }
 0x769   : > { %1149 = vst.msk [vmem:[%s597_s29] sm:$0xff] %vm634_vm0, %v1148_v62 }
 0x76a   : > { %1616 = shalt.err (!%p1613_p9)
}
 0x76b   : > { %1384 = dma.vmem_to_hbm [thread:$0]  (%p1815_p4), %s1165_s24, 128, %s1167_s0, %s1151_s21  }
 0x76c PF: > { %s2059_s18 = sld [smem:[#allocation15_spill]] }
 0x76d   : > { %s2060_s14 = sld [smem:[#allocation12_spill]] }
 0x772   : > { %p1406_p10 = scmp.ge.s32.totalorder %s2059_s18, 2 }
 0x773   : > { %s1178_s23 = sand.u32 1, %s2060_s14  }
 0x774   : > { %p1397_p11 = pnand %p1406_p10, %p1822_p8  ;;  %s1179_s26 = scalar_lea.sflag [#allocation4], %s1178_s23 }
 0x776   : > { %p1398_p12 = pneg %p1397_p11 }
 0x778   : > { %1650 = dma.done.wait (%p1398_p12), %s1179_s26, 128  }
 0x779   : > { %1652 = vsyncadd (%p1398_p12), %s1179_s26, 4294967168  ;;  %s31_s26 = sadd.s32 1, %s2059_s18   ;;  %s2062_s29 = sld [smem:[#allocation13_spill]] }
 0x77a   : > { %p28_p13 = scmp.ge.s32.totalorder %s31_s26, 4   ;;  %s2063_s23 = sld [smem:[#allocation19_spill]] }
 0x77b   : > { %s2064_s24 = sld [smem:[#allocation14_spill]]  ;;  %s2066_s21 = smov %s1659_s22 }
 0x77c   : > { %s2065_s25 = sld [smem:[#allocation16_spill]]  ;;  %30 = sbr.rel (!%p28_p13) target bundleno = 12 (0xc), region = 135 }
 0x77f   : > { %s2067_s22 = smov %s2062_s29 }
 0x781   :  { %1185 = vsyncpa [#allocation3], 1 }
 0x782   :  { %1187 = vsyncpa [#allocation3 + $0x1], 1 }
 0x783   :  { %1188 = vsyncpa [#allocation6], 1 }
 0x784   :  { %1189 = vsyncpa [#allocation4], 1 }
 0x785   :  { %1191 = vsyncpa [#allocation4 + $0x1], 1 }

// kernel: tpu_custom_call.1
= control target key start
LH: loop header
LB: loop body
LE: loop exit
PB: predicated region body
PF: predicated region fallthrough
CT: control target
= control target key end

     0   :  { %s2007_s0 = inlined_call_operand.vmem [shape: f32[2,8,32], index: 0, kind: input, shape index: {}]   ;;  %s2008_s1 = inlined_call_operand.vmem [shape: f32[2,8,32], index: 1, kind: input, shape index: {}]   ;;  %s2009_s2 = inlined_call_operand.vmem [shape: bf16[32,32], index: 2, kind: input, shape index: {}]   ;;  %s2010_s3 = inlined_call_operand.vmem [shape: f32[1,32], index: 3, kind: input, shape index: {}]   ;;  %s2011_s4 = inlined_call_operand.hbm [shape: bf16[32,64], index: 4, kind: input, shape index: {}]   ;;  %s2012_s5 = inlined_call_operand.vmem [shape: f32[1,64], index: 5, kind: input, shape index: {}]   ;;  %s2013_s6 = inlined_call_operand.hbm [shape: bf16[32,32], index: 6, kind: input, shape index: {}]   ;;  %s2014_s7 = inlined_call_operand.vmem [shape: f32[1,32], index: 7, kind: input, shape index: {}]   ;;  %s2015_s8 = inlined_call_operand.vmem [shape: f32[1,32], index: 8, kind: input, shape index: {}]   ;;  %s2016_s9 = inlined_call_operand.vmem [shape: f32[1,32], index: 9, kind: input, shape index: {}]   ;;  %s2017_s10 = inlined_call_operand.hbm [shape: bf16[32,64], index: 10, kind: input, shape index: {}]   ;;  %s2018_s11 = inlined_call_operand.vmem [shape: f32[1,64], index: 11, kind: input, shape index: {}]   ;;  %s2019_s12 = inlined_call_operand.vmem [shape: bf16[64,32], index: 12, kind: input, shape index: {}]   ;;  %s2020_s13 = inlined_call_operand.vmem [shape: f32[1,32], index: 13, kind: input, shape index: {}]   ;;  %s2021_s14 = inlined_call_operand.vmem [shape: f32[1,32], index: 14, kind: input, shape index: {}]   ;;  %s2022_s15 = inlined_call_operand.vmem [shape: f32[1,32], index: 15, kind: input, shape index: {}]   ;;  %s2023_s16 = inlined_call_operand.hbm [shape: f32[2,8,32], index: 16, kind: output, shape index: {}]  }
   0x1   :  { %2034 = sst [smem:[#allocation20_spill]] %s2007_s0 }
   0x2   :  { %2035 = sst [smem:[#allocation21_spill]] %s2013_s6 }
   0x3   :  { %2036 = sst [smem:[#allocation22_spill]] %s2021_s14 }
   0x4   :  { %2037 = sst [smem:[#allocation23_spill]] %s2022_s15 }
   0x5   :  { %2038 = sst [smem:[#allocation24_spill]] %s2023_s16 }
   0x6   :  { %21 = vsyncpa [#allocation3], 0 }
   0x7   :  { %22 = vsyncpa [#allocation6], 0 }
   0x8   :  { %23 = vsyncpa [#allocation4], 0 }
   0x9   :  { %25 = vsyncpa [#allocation4 + $0x1], 0  ;;  %s1775_s21 = smov 0   ;;  %s1777_s22 = smov 0  }
   0xa   :  { %s1779_s23 = smov 0   ;;  %s1781_s24 = smov 0  }
   0xb   :  { %s1783_s25 = smov 0   ;;  %s1785_s26 = smov 0  }
   0xc LB: > { %2039 = sst [smem:[#allocation12_spill]] %s1655_s21  ;;  %s1281_s27 = sadd.s32 4294967295, %s1675_s26   ;;  %s1675_s26 = sphi %s1785_s26, %s31_s26   ;;  %s1671_s25 = sphi %s1783_s25, %s2065_s25   ;;  %s1667_s24 = sphi %s1781_s24, %s2064_s24   ;;  %s1663_s23 = sphi %s1779_s23, %s2063_s23   ;;  %s1659_s22 = sphi %s1777_s22, %s2067_s22   ;;  %s1655_s21 = sphi %s1775_s21, %s2066_s21  }
   0xd   : > { %2040 = sst [smem:[#allocation13_spill]] %s1663_s23  ;;  %s1282_s28 = sadd.s32 4294967294, %s1675_s26  }
   0xe   : > { %2041 = sst [smem:[#allocation14_spill]] %s1671_s25  ;;  %s43_s29 = sadd.s32 1, %s1671_s25 }
   0xf   : > { %2042 = sst [smem:[#allocation15_spill]] %s1675_s26  ;;  %s400_s30 = sadd.s32 1, %s1663_s23 }
  0x10   : > { %p45_p0 = scmp.ge.s32.totalorder %s43_s29, 2  ;;  %p410_p1 = scmp.ne.s32.totalorder %s1663_s23, %s1659_s22 }
  0x11   : > { %p411_p2 = scmp.eq.s32.totalorder %s1281_s27, 1  ;;  %p416_p3 = scmp.ne.s32.totalorder %s1659_s22, %s1655_s21 }
  0x12   : > { %s2069_s29 = smov (%p45_p0, %s43_s29), 0  ;;  %p417_p5 = scmp.eq.s32.totalorder %s1282_s28, 1 }
  0x13   : > { %2043 = sst [smem:[#allocation16_spill]] %s2069_s29  ;;  %p1815_p4 = por %p411_p2, %p410_p1 }
  0x14   : > { %s395_s17 = ssub.s32 %s1671_s25, %s2069_s29  ;;  %p1283_p6 = scmp.ge.s32.totalorder %s1675_s26, 1 }
  0x15   : > { %s2044_s0 = scalar_select %p1815_p4, 1, 0 }
  0x16   : > { %p398_p7 = scmp.eq.s32.totalorder %s395_s17, 0  ;;  %p1822_p8 = por %p417_p5, %p416_p3 }
  0x17   : > { %2045 = sst [smem:[#allocation17_spill]] %s2044_s0  ;;  %p424_p9 = scmp.lt.s32.totalorder %s1675_s26, 3 }
  0x18   : > { %s2046_s18 = scalar_select %p1822_p8, 1, 0 }
  0x19   : > { %s1828_s19 = scalar_select %p398_p7, %s1663_s23, %s400_s30  }
  0x1a   : > { %2047 = sst [smem:[#allocation18_spill]] %s2046_s18  ;;  %p1830_p10 = pnand %p1283_p6, %p424_p9 }
  0x1b   : > { %2048 = sst [smem:[#allocation19_spill]] %s1828_s19  ;;  %p1834_p11 = scmp.eq.s32.totalorder %s1281_s27, 0 }
  0x1c   : > { %p1386_p12 = pneg %p1830_p10  ;;  %s2051_s6 = sld [smem:[#allocation21_spill]] }
  0x1d   : > { %s1677_s25 = smov [#allocation5]   ;;  %s1678_s19 = smov 64  }
  0x1e   : > { %p1845_p13 = pnand %p1834_p11, %p1386_p12  ;;  %s460_s27 = sshll.u32 %s1677_s25, 4  ;;  %s461_s27 = int_to_ptr.vmem [resolvable:$true] %s460_s27 }
  0x1f   : > { %s1679_s23 = smov 4   ;;  %s441_s28 = sshll.u32 %s2011_s4, 4  ;;  %s442_s28 = int_to_ptr.hbm [resolvable:$true] %s441_s28 }
  0x20   : > { %s1680_s17 = smov [#allocation2]   ;;  %s481_s16 = sshll.u32 %s2017_s10, 4  ;;  %s482_s16 = int_to_ptr.hbm [resolvable:$true] %s481_s16 }
  0x21   : > { %s1681_s25 = smov [#allocation7]  }
  0x22   : > { %s458_s29 = sshll.u32 %s2051_s6, 4  ;;  %s443_s6 = sshll.u32 %s1680_s17, 4  ;;  %s459_s29 = int_to_ptr.hbm [resolvable:$true] %s458_s29  ;;  %s444_s6 = int_to_ptr.vmem [resolvable:$true] %s443_s6 }
  0x23   : > { %1392 = dma.hbm_to_vmem [thread:$0]  (!%p1845_p13), %s459_s29, 256, %s461_s27, [#allocation6], %s1678_s19, %s1678_s19, %s1679_s23  }
  0x24   : > { %1389 = dma.hbm_to_vmem [thread:$0]  (!%p1845_p13), %s442_s28, 256, %s444_s6, [#allocation3], %s1678_s19, %s1678_s19, %s1679_s23  }
  0x25   : > { %s483_s14 = sshll.u32 %s1681_s25, 4  ;;  %531 = sbr.rel (%p1830_p10) target bundleno = 1900 (0x76c), region = 84  ;;  %s484_s14 = int_to_ptr.vmem [resolvable:$true] %s483_s14 }
  0x26   : > { %1395 = dma.hbm_to_vmem [thread:$0]  (!%p1845_p13), %s482_s16, 256, %s484_s14, [#allocation6], %s1678_s19, %s1678_s19, %s1679_s23  }
  0x2a   : > { %1642 = dma.done.wait (%p1834_p11), [#allocation3], 256  }
  0x2b   : > { %1644 = vsyncadd (%p1834_p11), [#allocation3], 4294967040 }
  0x2c   : > { %1646 = dma.done.wait (%p1834_p11), [#allocation6], 512  }
  0x2d   : > { %1648 = vsyncadd (%p1834_p11), [#allocation6], 4294966784  ;;  %p598_p0 = scmp.lt.s32.totalorder %s1667_s24, 1  ;;  %s2053_s0 = sld [smem:[#allocation20_spill]]  ;;  %v1363_v0 = vld [vmem:[#allocation2 + $0x8] sm:$0xff]  ;;  %v1362_v1 = vld [vmem:[#allocation2] sm:$0xff] }
  0x2e   : > { %v1361_v3 = vld [vmem:[%s2009_s2 + $0x8] sm:$0xff]  ;;  %v1360_v4 = vld [vmem:[%s2009_s2] sm:$0xff]  ;;  %681 = vmatpush.bf16.msra.mxu1 %v1363_v0  ;;  %vm634_vm0 = vcmask 261120   ;;  %vm703_vm1 = vcmask 64512   ;;  %s1684_s15 = smov 104   ;;  %s1685_s16 = smov 96  }
  0x2f   : > { %s599_s6 = scalar_select %p598_p0, %s1667_s24, 1  ;;  %644 = vmatpush.bf16.msra.mxu0 %v1361_v3  ;;  %v1468_v8 = vld [vmem:[%s2012_s5] ss:$0 sm:$0xff]  ;;  %vm835_vm2 = vcmask 1043456   ;;  %vm943_vm3 = vcmask 130048   ;;  %vm946_vm4 = vcmask 195584  }
  0x30   : > { %v1469_v9 = vld [vmem:[%s2010_s3] ss:$0 sm:$0xff]  ;;  %s1687_s26 = smov 8   ;;  %s1688_s29 = smov 24   ;;  %vm1099_vm9 = vcmask 523264  }
  0x31   : > { %s1293_s14 = sshll.u32 %s599_s6, 3  ;;  %s1682_s6 = smov 112  }
  0x32   : > { %s608_s23 = scalar_lea.vmem %s2008_s1, %s1293_s14  ;;  %682 = vmatpush.bf16.msra.mxu1 %v1362_v1  ;;  %s1357_s20 = sshll.u32 %s1667_s24, 3 }
  0x33   : > { %s604_s18 = scalar_lea.vmem %s2053_s0, %s1293_s14  ;;  %v612_v2 = vld [vmem:[%s608_s23] sm:$0xff]  ;;  %645 = vmatpush.bf16.msra.mxu0 %v1360_v4  ;;  %s1683_s14 = smov 120  }
  0x34   : > { %v1885_v5 = vld [vmem:[%s604_s18] sm:$0xff]  ;;  %v613_v6 = vpack.c.bf16 %v612_v2, %v612_v2  ;;  %s1686_s23 = smov 16   ;;  %s595_s18 = sand.u32 1, %s1659_s22  }
  0x35   : > { %v611_v7 = vpack.c.bf16 %v1885_v5, %v1885_v5  ;;  %s1292_s19 = sshll.u32 %s595_s18, 3  ;;  %s2054_s27 = sld [smem:[#allocation22_spill]] }
  0x36   : > { %1312 = vmatmul.msk.bf16.vlgmr.msra.gmra.mxu1 %vm634_vm0, %v613_v6  ;;  %s2055_s25 = sld [smem:[#allocation24_spill]]  ;;  %s1151_s21 = scalar_lea.sflag [#allocation4], %s595_s18 }
  0x37   : > { %1303 = vmatmul.msk.bf16.vlgmr.msra.gmra.mxu0 %vm634_vm0, %v611_v7 }
  0xb3   : > { %v684_v10 = vpop.f32.mrf.mxu1 }
  0xb4   : > { %v685_v11 = vadd.f32 %v1468_v8, %v684_v10  ;;  %v647_v12 = vpop.f32.mrf.mxu0 }
  0xb5   : > { %v648_v13 = vadd.f32 %v1469_v9, %v647_v12 }
  0xb6   : > { %v1897_v14 = vpack.c.bf16 %v685_v11, %v685_v11 }
  0xb7   : > { %v651_v15 = vpack.c.bf16 %v648_v13, %v648_v13 }
  0xb8   : > { %699 = vrot.lane.b32.xlu1 %v1897_v14, %s1682_s6  ;;  %697 = vrot.lane.b32.xlu0 %v1897_v14, %s1683_s14  ;;  %v708_v16 = vsel %vm703_vm1, %v1897_v14, 0  ;;  %v828_v60 = vunpack.c.l.b16 %v1897_v14 }
  0xb9   : > { %717 = vmatpush.bf16.xpose.msra.mxu2 %v708_v16  ;;  %692 = vrot.lane.b32.xlu2 %v651_v15, %s1682_s6  ;;  %s2056_s6 = smov %s2055_s25 }
  0xba   : > { %v829_v62 = vpack.c.b16 %v828_v60, %v828_v60 }
  0xbb   : > { %v686_v17 = vpop.f32.mrf.mxu1 }
  0xbc   : > { %v649_v18 = vpop.f32.mrf.mxu0 }
  0xc0   : > { %701 = vrot.lane.b32.xlu1 %v1897_v14, %s1684_s15  ;;  %690 = vrot.lane.b32.xlu0 %v651_v15, %s1683_s14  ;;  %s1162_s14 = scalar_lea.hbm %s2055_s25, %s1357_s20 }
  0xc1   : > { %1313 = vmatmul.msk.bf16.vlgmr.msra.gmra.mxu2 %vm703_vm1, %v651_v15  ;;  %694 = vrot.lane.b32.xlu2 %v651_v15, %s1684_s15  ;;  %s1166_s0 = sshll.u32 %s1162_s14, 4  ;;  %s1167_s0 = int_to_ptr.hbm [resolvable:$true] %s1166_s0 }
  0xc2   : > { %s1603_s30 = sshra.s32 %s1167_s0, 4  ;;  %s1604_s30 = int_to_ptr.hbm [resolvable:$true] %s1603_s30 }
  0xc3   : > { %s1605_s20 = scalar_lea.hbm %s1604_s30, 8  ;;  %p1610_p5 = scmp.lt.s32.totalorder %s1604_s30, %s2056_s6 }
  0xc4   : > { %p1606_p1 = scmp.ne.s32.totalorder %s1604_s30, %s1605_s20 }
  0xc6   : > { %p1607_p2 = pnand %p1606_p1, %p1815_p4 }
  0xc8   : > { %p1608_p3 = pneg %p1607_p2 }
 0x113   : > { %v693_v23 = vpop.permute.xlu2 %692 }
 0x11b   : > { %v695_v27 = vpop.permute.xlu2 %694 }
 0x12a   : > { %v700_v19 = vpop.permute.xlu1 %699  ;;  %v698_v20 = vpop.permute.xlu0 %697 }
 0x12b   : > { %v727_v21 = vsel %vm703_vm1, %v698_v20, 0  ;;  %v746_v22 = vsel %vm703_vm1, %v700_v19, 0  ;;  %v875_v55 = vunpack.c.l.b16 %v700_v19  ;;  %v852_v56 = vunpack.c.l.b16 %v698_v20 }
 0x12c   : > { %736 = vmatpush.bf16.xpose.msra.mxu3 %v727_v21  ;;  %755 = vmatpush.bf16.xpose.msrb.mxu0 %v746_v22 }
 0x12d   : > { %v876_v57 = vpack.c.b16 %v875_v55, %v875_v55  ;;  %v853_v58 = vpack.c.b16 %v852_v56, %v852_v56  ;;  %v1470_v55 = vld [vmem:[%s2014_s7] ss:$0 sm:$0xff] }
 0x132   : > { %v702_v24 = vpop.permute.xlu1 %701  ;;  %v691_v25 = vpop.permute.xlu0 %690 }
 0x133   : > { %1314 = vmatmul.msk.bf16.vlgmr.msra.gmra.mxu3 %vm703_vm1, %v691_v25  ;;  %1315 = vmatmul.msk.bf16.vlgmr.msrb.gmra.mxu0 %vm703_vm1, %v693_v23  ;;  %v765_v26 = vsel %vm703_vm1, %v702_v24, 0  ;;  %v898_v59 = vunpack.c.l.b16 %v702_v24 }
 0x134   : > { %774 = vmatpush.bf16.xpose.msrb.mxu1 %v765_v26 }
 0x135   : > { %v899_v61 = vpack.c.b16 %v898_v59, %v898_v59 }
 0x13b   : > { %1316 = vmatmul.msk.bf16.vlgmr.msrb.gmra.mxu1 %vm703_vm1, %v695_v27 }
 0x144   : > { %v719_v28 = vpop.f32.mrf.mxu2 }
 0x145   : > { %v780_v39 = vsel %vm703_vm1, %v719_v28, -inf }
 0x14c   : > { %v721_v29 = vpop.f32.mrf.mxu2 }
 0x1b0   : > { %v757_v30 = vpop.f32.mrf.mxu0 }
 0x1b1   : > { %v786_v31 = vsel %vm703_vm1, %v757_v30, -inf }
 0x1b2   : > { %787 = vmax.xlane.f32.xlu1 %v786_v31 }
 0x1b6   : > { %v738_v32 = vpop.f32.mrf.mxu3 }
 0x1b7   : > { %v783_v33 = vsel %vm703_vm1, %v738_v32, -inf }
 0x1b8   : > { %v759_v34 = vpop.f32.mrf.mxu0  ;;  %v776_v35 = vpop.f32.mrf.mxu1  ;;  %784 = vmax.xlane.f32.xlu0 %v783_v33 }
 0x1b9   : > { %v789_v36 = vsel %vm703_vm1, %v776_v35, -inf }
 0x1ba   : > { %790 = vmax.xlane.f32.xlu2 %v789_v36 }
 0x1be   : > { %v740_v37 = vpop.f32.mrf.mxu3 }
 0x1c0   : > { %v778_v38 = vpop.f32.mrf.mxu1 }
 0x1c2   : > { %781 = vmax.xlane.f32.xlu2 %v780_v39 }
 0x225   : > { %v788_v40 = vpop.xlane.xlu1 %787 }
 0x226   : > { %v794_v41 = vsub.f32 %v757_v30, %v788_v40 }
 0x228   : > { %v800_v42 = vmul.f32 1.442695, %v794_v41 }
 0x22a   : > { %1477 = vpow2.f32 %v800_v42 }
 0x22b   : > { %v785_v43 = vpop.xlane.xlu0 %784 }
 0x22c   : > { %v793_v44 = vsub.f32 %v738_v32, %v785_v43 }
 0x22d   : > { %v791_v45 = vpop.xlane.xlu2 %790 }
 0x22e   : > { %v798_v46 = vmul.f32 1.442695, %v793_v44  ;;  %v795_v47 = vsub.f32 %v776_v35, %v791_v45 }
 0x230   : > { %v1478_v48 = vpop.eup %1477  ;;  %1479 = vpow2.f32 %v798_v46  ;;  %v802_v49 = vmul.f32 1.442695, %v795_v47  ;;  %v1365_v46 = vld [vmem:[#allocation5 + $0x8] sm:$0xff]  ;;  %v1364_v47 = vld [vmem:[#allocation5] sm:$0xff] }
 0x231   : > { %v810_v50 = vsel %vm703_vm1, %v1478_v48, 0.0 }
 0x232   : > { %1481 = vpow2.f32 %v802_v49  ;;  %811 = vadd.xlane.f32.xlu1 %v810_v50 }
 0x235   : > { %v782_v63 = vpop.xlane.xlu2 %781 }
 0x236   : > { %v1480_v51 = vpop.eup %1479  ;;  %v792_v0 = vsub.f32 %v719_v28, %v782_v63 }
 0x237   : > { %v807_v52 = vsel %vm703_vm1, %v1480_v51, 0.0 }
 0x238   : > { %v1482_v53 = vpop.eup %1481  ;;  %808 = vadd.xlane.f32.xlu0 %v807_v52  ;;  %v796_v1 = vmul.f32 1.442695, %v792_v0 }
 0x239   : > { %v813_v54 = vsel %vm703_vm1, %v1482_v53, 0.0 }
 0x23a   : > { %814 = vadd.xlane.f32.xlu2 %v813_v54  ;;  %1483 = vpow2.f32 %v796_v1 }
 0x240   : > { %v1484_v2 = vpop.eup %1483 }
 0x241   : > { %v804_v3 = vsel %vm703_vm1, %v1484_v2, 0.0 }
 0x24b   : > { %877 = vrot.lane.b32.xlu1 %v876_v57, %s1685_s16 }
 0x24c   : > { %854 = vrot.lane.b32.xlu0 %v853_v58, %s1685_s16 }
 0x252   : > { %900 = vrot.lane.b32.xlu2 %v899_v61, %s1685_s16  ;;  %v1689_v61 = vmov 32.0  }
 0x253   : > { %830 = vrot.lane.b32.xlu1 %v829_v62, %s1685_s16 }
 0x276   : > { %805 = vadd.xlane.f32.xlu0 %v804_v3 }
 0x2a5   : > { %v812_v6 = vpop.xlane.xlu1 %811 }
 0x2ab   : > { %v809_v7 = vpop.xlane.xlu0 %808 }
 0x2ad   : > { %v815_v4 = vpop.xlane.xlu2 %814 }
 0x2ae   : > { %1485 = vrcp.f32 %v815_v4 }
 0x2af   : > { %1487 = vrcp.f32 %v812_v6 }
 0x2b0   : > { %1489 = vrcp.f32 %v809_v7 }
 0x2b4   : > { %v1486_v8 = vpop.eup %1485 }
 0x2b5   : > { %v823_v9 = vmul.f32 %v1486_v8, %v1482_v53  ;;  %v901_v10 = vpop.permute.xlu2 %900  ;;  %v1488_v13 = vpop.eup %1487 }
 0x2b6   : > { %v906_v11 = vsel %vm835_vm2, %v901_v10, 0  ;;  %v1490_v14 = vpop.eup %1489  ;;  %v822_v15 = vmul.f32 %v1488_v13, %v1478_v48  ;;  %v1366_v10 = vld [vmem:[#allocation7] sm:$0xff] }
 0x2b7   : > { %v827_v12 = vpack.c.bf16 %v823_v9, %v823_v9  ;;  %915 = vmatpush.bf16.msra.mxu1 %v906_v11  ;;  %v821_v16 = vmul.f32 %v1490_v14, %v1480_v51  ;;  %v1371_v11 = vld [vmem:[%s2019_s12 + $0x18] sm:$0xff]  ;;  %v1370_v14 = vld [vmem:[%s2019_s12 + $0x10] sm:$0xff] }
 0x2b8   : > { %v826_v21 = vpack.c.bf16 %v822_v15, %v822_v15 }
 0x2b9   : > { %v825_v22 = vpack.c.bf16 %v821_v16, %v821_v16 }
 0x2ba   : > { %1320 = vmatmul.msk.bf16.vlgmr.msra.gmra.mxu1 %vm703_vm1, %v827_v12 }
 0x2bd   : > { %v878_v17 = vpop.permute.xlu1 %877 }
 0x2be   : > { %v883_v18 = vsel %vm835_vm2, %v878_v17, 0  ;;  %v855_v19 = vpop.permute.xlu0 %854 }
 0x2bf   : > { %892 = vmatpush.bf16.msra.mxu0 %v883_v18  ;;  %v860_v20 = vsel %vm835_vm2, %v855_v19, 0 }
 0x2c0   : > { %869 = vmatpush.bf16.msrb.mxu3 %v860_v20 }
 0x2c2   : > { %1319 = vmatmul.msk.bf16.vlgmr.msra.gmra.mxu0 %vm703_vm1, %v826_v21 }
 0x2c3   : > { %1318 = vmatmul.msk.bf16.vlgmr.msrb.gmra.mxu3 %vm703_vm1, %v825_v22  ;;  %1107 = vmatpush.bf16.msrb.mxu0 %v1371_v11  ;;  %v1471_v22 = vld [vmem:[%s2015_s8] ss:$0 sm:$0xff] }
 0x2c5   : > { %v831_v23 = vpop.permute.xlu1 %830 }
 0x2c6   : > { %v837_v24 = vsel %vm835_vm2, %v831_v23, 0 }
 0x2c7   : > { %846 = vmatpush.bf16.msrb.mxu2 %v837_v24  ;;  %1108 = vmatpush.bf16.msrb.mxu0 %v1370_v14  ;;  %v1472_v24 = vld [vmem:[%s2016_s9] ss:$0 sm:$0xff] }
 0x2cb   : > { %977 = vmatpush.bf16.msra.mxu2 %v1365_v46 }
 0x2cf   : > { %978 = vmatpush.bf16.msra.mxu2 %v1364_v47 }
 0x2e9   : > { %v806_v25 = vpop.xlane.xlu0 %805 }
 0x2ea   : > { %1491 = vrcp.f32 %v806_v25 }
 0x2eb   : > { %1493 = vrcp.f32 %v1689_v61 }
 0x2f0   : > { %v1492_v26 = vpop.eup %1491 }
 0x2f1   : > { %v820_v27 = vmul.f32 %v1492_v26, %v1484_v2  ;;  %v1494_v62 = vpop.eup %1493 }
 0x2f2   : > { %v989_v63 = vmul.f32 32.0, %v1494_v62  ;;  %vm993_vm5 = vweird.f32 %v1494_v62 }
 0x2f3   : > { %v824_v28 = vpack.c.bf16 %v820_v27, %v820_v27 }
 0x2f4   : > { %v990_v0 = vsub.f32 1.0, %v989_v63 }
 0x2f5   : > { %1317 = vmatmul.msk.bf16.vlgmr.msrb.gmra.mxu2 %vm703_vm1, %v824_v28 }
 0x2f6   : > { %v991_v1 = vmul.f32 %v1494_v62, %v990_v0 }
 0x2f8   : > { %v992_v2 = vadd.f32 %v1494_v62, %v991_v1 }
 0x2fa   : > { %v994_v3 = vsel %vm993_vm5, %v1494_v62, %v992_v2 }
 0x337   : > { %v917_v29 = vpop.f32.mrf.mxu1 }
 0x338   : > { %v924_v39 = vpack.c.bf16 %v917_v29, %v917_v29  ;;  %v1369_v29 = vld [vmem:[%s2019_s12 + $0x8] sm:$0xff] }
 0x339   : > { %1109 = vmatpush.bf16.msrb.mxu0 %v1369_v29 }
 0x33a   : > { %v936_v42 = vunpack.c.l.b16 %v924_v39 }
 0x33c   : > { %v937_v43 = vpack.c.b16 %v936_v42, %v936_v42 }
 0x33f   : > { %v894_v30 = vpop.f32.mrf.mxu0  ;;  %v919_v31 = vpop.f32.mrf.mxu1 }
 0x340   : > { %v923_v32 = vpack.c.bf16 %v894_v30, %v894_v30  ;;  %v1368_v30 = vld [vmem:[%s2019_s12] sm:$0xff] }
 0x341   : > { %1110 = vmatpush.bf16.msrb.mxu0 %v1368_v30  ;;  %v1473_v31 = vld [vmem:[%s2018_s11] ss:$0 sm:$0xff] }
 0x342   : > { %v931_v33 = vunpack.c.l.b16 %v923_v32 }
 0x344   : > { %v932_v34 = vpack.c.b16 %v931_v33, %v931_v33 }
 0x346   : > { %933 = vrot.lane.b32.xlu1 %v932_v34, %s1686_s23  ;;  %v871_v35 = vpop.f32.mrf.mxu3 }
 0x347   : > { %v922_v36 = vpack.c.bf16 %v871_v35, %v871_v35  ;;  %v896_v37 = vpop.f32.mrf.mxu0 }
 0x348   : > { %v1474_v37 = vld [vmem:[%s2020_s13] ss:$0 sm:$0xff] }
 0x349   : > { %v926_v38 = vunpack.c.l.b16 %v922_v36 }
 0x34b   : > { %v927_v40 = vpack.c.b16 %v926_v38, %v926_v38 }
 0x34d   : > { %928 = vrot.lane.b32.xlu2 %v927_v40, %s1687_s26  ;;  %s2058_s26 = sld [smem:[#allocation23_spill]] }
 0x34e   : > { %v873_v41 = vpop.f32.mrf.mxu3 }
 0x355   : > { %938 = vrot.lane.b32.xlu2 %v937_v43, %s1688_s29  ;;  %s597_s29 = scalar_lea.vmem [#allocation8], %s1292_s19  ;;  %s1609_s19 = scalar_lea.hbm %s2056_s6, 16 }
 0x356   : > { %s1164_s24 = sshll.u32 %s597_s29, 4  ;;  %p1611_p6 = scmp.lt.s32.totalorder %s1609_s19, %s1605_s20  ;;  %s1165_s24 = int_to_ptr.vmem [resolvable:$true] %s1164_s24 }
 0x358   : > { %p1612_p7 = por %p1611_p6, %p1610_p5 }
 0x35a   : > { %p1613_p9 = pnand %p1612_p7, %p1608_p3 }
 0x378   : > { %v848_v44 = vpop.f32.mrf.mxu2 }
 0x379   : > { %v921_v49 = vpack.c.bf16 %v848_v44, %v848_v44 }
 0x380   : > { %v850_v45 = vpop.f32.mrf.mxu2 }
 0x3a7   : > { %v929_v48 = vpop.permute.xlu2 %928 }
 0x3a8   : > { %v942_v50 = vsel %vm703_vm1, %v921_v49, %v929_v48 }
 0x3af   : > { %v939_v52 = vpop.permute.xlu2 %938 }
 0x3b8   : > { %v934_v51 = vpop.permute.xlu1 %933 }
 0x3b9   : > { %v945_v53 = vsel %vm943_vm3, %v942_v50, %v934_v51 }
 0x3ba   : > { %v948_v54 = vsel %vm946_vm4, %v945_v53, %v939_v52 }
 0x3bb   : > { %1329 = vmatmul.msk.bf16.vlgmr.msra.gmra.mxu2 %vm634_vm0, %v948_v54 }
 0x43e   : > { %v980_v56 = vpop.f32.mrf.mxu2 }
 0x43f   : > { %v981_v57 = vadd.f32 %v1470_v55, %v980_v56 }
 0x441   : > { %v984_v58 = vadd.f32 %v981_v57, %v1885_v5  ;;  %v1367_v5 = vld [vmem:[#allocation7 + $0x8] sm:$0xff]  ;;  %v1475_v57 = vld [vmem:[%s2054_s27] ss:$0 sm:$0xff] }
 0x442   : > { %1054 = vmatpush.bf16.msra.mxu3 %v1367_v5 }
 0x443   : > { %v985_v59 = vsel %vm634_vm0, %v984_v58, 0.0 }
 0x444   : > { %986 = vadd.xlane.f32.xlu1 %v985_v59 }
 0x446   : > { %v982_v60 = vpop.f32.mrf.mxu2  ;;  %1055 = vmatpush.bf16.msra.mxu3 %v1366_v10 }
 0x447   : > { %v1476_v60 = vld [vmem:[%s2058_s26] ss:$0 sm:$0xff] }
 0x4b7   : > { %v987_v4 = vpop.xlane.xlu1 %986 }
 0x4b8   : > { %v995_v6 = vmul.f32 %v994_v3, %v987_v4 }
 0x4ba   : > { %v996_v7 = vsub.f32 %v984_v58, %v995_v6 }
 0x4bc   : > { %v997_v8 = vmul.f32 %v996_v7, %v996_v7 }
 0x4be   : > { %v998_v9 = vsel %vm634_vm0, %v997_v8, 0.0 }
 0x4bf   : > { %999 = vadd.xlane.f32.xlu2 %v998_v9 }
 0x532   : > { %v1000_v12 = vpop.xlane.xlu2 %999 }
 0x533   : > { %v1001_v13 = vmul.f32 %v1000_v12, %v994_v3 }
 0x535   : > { %v1002_v15 = vadd.f32 1e-05, %v1001_v13 }
 0x537   : > { %1495 = vrsqrt.f32 %v1002_v15  ;;  %vm1009_vm7 = vweird.f32 %v1002_v15 }
 0x53d   : > { %v1496_v16 = vpop.eup %1495 }
 0x53e   : > { %v1004_v17 = vmul.f32 %v1496_v16, %v1002_v15  ;;  %vm1010_vm6 = vweird.f32 %v1496_v16 }
 0x53f   : > { %vm1011_vm8 = vmor %vm1009_vm7, %vm1010_vm6 }
 0x540   : > { %v1005_v18 = vmul.f32 %v1496_v16, %v1004_v17 }
 0x542   : > { %v1006_v19 = vmul.f32 0.5, %v1005_v18 }
 0x544   : > { %v1007_v20 = vsub.f32 1.5, %v1006_v19 }
 0x546   : > { %v1008_v21 = vmul.f32 %v1496_v16, %v1007_v20 }
 0x548   : > { %v1012_v23 = vsel %vm1011_vm8, %v1496_v16, %v1008_v21 }
 0x549   : > { %v1013_v25 = vmul.f32 %v1012_v23, %v996_v7 }
 0x54b   : > { %v1018_v26 = vmul.f32 %v1471_v22, %v1013_v25 }
 0x54d   : > { %v1023_v27 = vadd.f32 %v1472_v24, %v1018_v26 }
 0x54f   : > { %v1024_v28 = vpack.c.bf16 %v1023_v27, %v1023_v27 }
 0x551   : > { %1338 = vmatmul.msk.bf16.vlgmr.msra.gmra.mxu3 %vm634_vm0, %v1024_v28 }
 0x5d4   : > { %v1057_v32 = vpop.f32.mrf.mxu3 }
 0x5d5   : > { %v1058_v33 = vadd.f32 %v1473_v31, %v1057_v32 }
 0x5d7   : > { %v1061_v34 = vmax.f32 %v1058_v33, 0.0 }
 0x5d9   : > { %v1062_v35 = vpack.c.bf16 %v1061_v34, %v1061_v34 }
 0x5db   : > { %1355 = vmatmul.msk.bf16.vlgmr.msrb.gmra.mxu0 %vm1099_vm9, %v1062_v35 }
 0x5dc   : > { %v1059_v36 = vpop.f32.mrf.mxu3 }
 0x658   : > { %v1112_v38 = vpop.f32.mrf.mxu0 }
 0x659   : > { %v1113_v39 = vadd.f32 %v1474_v37, %v1112_v38 }
 0x65b   : > { %v1116_v40 = vadd.f32 %v1113_v39, %v1023_v27 }
 0x65d   : > { %v1117_v41 = vsel %vm634_vm0, %v1116_v40, 0.0 }
 0x65e   : > { %1118 = vadd.xlane.f32.xlu0 %v1117_v41 }
 0x660   : > { %v1114_v42 = vpop.f32.mrf.mxu0 }
 0x6d1   : > { %v1119_v43 = vpop.xlane.xlu0 %1118 }
 0x6d2   : > { %v1120_v44 = vmul.f32 %v1119_v43, %v994_v3 }
 0x6d4   : > { %v1121_v45 = vsub.f32 %v1116_v40, %v1120_v44 }
 0x6d6   : > { %v1122_v46 = vmul.f32 %v1121_v45, %v1121_v45 }
 0x6d8   : > { %v1123_v47 = vsel %vm634_vm0, %v1122_v46, 0.0 }
 0x6d9   : > { %1124 = vadd.xlane.f32.xlu0 %v1123_v47 }
 0x74c   : > { %v1125_v48 = vpop.xlane.xlu0 %1124 }
 0x74d   : > { %v1126_v49 = vmul.f32 %v1125_v48, %v994_v3 }
 0x74f   : > { %v1127_v50 = vadd.f32 1e-05, %v1126_v49 }
 0x751   : > { %1497 = vrsqrt.f32 %v1127_v50  ;;  %vm1134_vm11 = vweird.f32 %v1127_v50 }
 0x757   : > { %v1498_v51 = vpop.eup %1497 }
 0x758   : > { %v1129_v52 = vmul.f32 %v1498_v51, %v1127_v50  ;;  %vm1135_vm10 = vweird.f32 %v1498_v51 }
 0x759   : > { %vm1136_vm12 = vmor %vm1134_vm11, %vm1135_vm10 }
 0x75a   : > { %v1130_v53 = vmul.f32 %v1498_v51, %v1129_v52 }
 0x75c   : > { %v1131_v54 = vmul.f32 0.5, %v1130_v53 }
 0x75e   : > { %v1132_v55 = vsub.f32 1.5, %v1131_v54 }
 0x760   : > { %v1133_v56 = vmul.f32 %v1498_v51, %v1132_v55 }
 0x762   : > { %v1137_v58 = vsel %vm1136_vm12, %v1498_v51, %v1133_v56 }
 0x763   : > { %v1138_v59 = vmul.f32 %v1137_v58, %v1121_v45 }
 0x765   : > { %v1143_v61 = vmul.f32 %v1475_v57, %v1138_v59 }
 0x767   : > { %v1148_v62 = vadd.f32 %v1476_v60, %v1143_v61 }
 0x769   : > { %1149 = vst.msk [vmem:[%s597_s29] sm:$0xff] %vm634_vm0, %v1148_v62 }
 0x76a   : > { %1616 = shalt.err (!%p1613_p9)
}
 0x76b   : > { %1384 = dma.vmem_to_hbm [thread:$0]  (%p1815_p4), %s1165_s24, 128, %s1167_s0, %s1151_s21  }
 0x76c PF: > { %s2059_s18 = sld [smem:[#allocation15_spill]] }
 0x76d   : > { %s2060_s14 = sld [smem:[#allocation12_spill]] }
 0x772   : > { %p1406_p10 = scmp.ge.s32.totalorder %s2059_s18, 2 }
 0x773   : > { %s1178_s23 = sand.u32 1, %s2060_s14  }
 0x774   : > { %p1397_p11 = pnand %p1406_p10, %p1822_p8  ;;  %s1179_s26 = scalar_lea.sflag [#allocation4], %s1178_s23 }
 0x776   : > { %p1398_p12 = pneg %p1397_p11 }
 0x778   : > { %1650 = dma.done.wait (%p1398_p12), %s1179_s26, 128  }
 0x779   : > { %1652 = vsyncadd (%p1398_p12), %s1179_s26, 4294967168  ;;  %s31_s26 = sadd.s32 1, %s2059_s18   ;;  %s2062_s29 = sld [smem:[#allocation13_spill]] }
 0x77a   : > { %p28_p13 = scmp.ge.s32.totalorder %s31_s26, 4   ;;  %s2063_s23 = sld [smem:[#allocation19_spill]] }
 0x77b   : > { %s2064_s24 = sld [smem:[#allocation14_spill]]  ;;  %s2066_s21 = smov %s1659_s22 }
 0x77c   : > { %s2065_s25 = sld [smem:[#allocation16_spill]]  ;;  %30 = sbr.rel (!%p28_p13) target bundleno = 12 (0xc), region = 135 }
 0x77f   : > { %s2067_s22 = smov %s2062_s29 }
 0x781   :  { %1185 = vsyncpa [#allocation3], 1 }
 0x782   :  { %1187 = vsyncpa [#allocation3 + $0x1], 1 }
 0x783   :  { %1188 = vsyncpa [#allocation6], 1 }
 0x784   :  { %1189 = vsyncpa [#allocation4], 1 }
 0x785   :  { %1191 = vsyncpa [#allocation4 + $0x1], 1 }

</bundles_post_ra>
